<compile_context>
chip_gen: v7x
topology: tpu7x:2x2x1
jax: 0.10.0
libtpu: 0.0.40
codegen_flags: <defaults>
</compile_context>

<pallas_src>
import functools
import math

import jax
import jax.numpy as jnp
from jax.experimental import pallas as pl
from jax.experimental.pallas import tpu as pltpu

_MXU_DTYPE = jnp.bfloat16  # MXU operand dtype; accumulation stays f32


# --------------------------------------------------------------------- in-kernel building blocks

def _mxu_dot(a, b):
    """MXU matmul with bf16 operands, f32 accumulation."""
    return jnp.dot(a.astype(_MXU_DTYPE), b.astype(_MXU_DTYPE),
                   preferred_element_type=jnp.float32)


def _col_to_row(v_col):
    """(n,1) column vector -> (1,n) row vector with no transpose op:
    broadcast onto the diagonal (VPU select) then column-reduce (XLU)."""
    n = v_col.shape[0]
    eye = (jax.lax.broadcasted_iota(jnp.int32, (n, n), 0)
           == jax.lax.broadcasted_iota(jnp.int32, (n, n), 1))
    return jnp.sum(jnp.where(eye, v_col, 0.0), axis=0, keepdims=True)


def _gcn_relu(a, x, w, b):
    """relu( D̃^{-1/2}(A+I)D̃^{-1/2} (xW) + b ), normalization folded into row scalings."""
    n = a.shape[0]
    eye = (jax.lax.broadcasted_iota(jnp.int32, (n, n), 0)
           == jax.lax.broadcasted_iota(jnp.int32, (n, n), 1))
    a_hat = a + jnp.where(eye, 1.0, 0.0).astype(a.dtype)
    deg = jnp.sum(a_hat, axis=1, keepdims=True)            # (n,1), >= 1 (self loop)
    dis = jax.lax.rsqrt(deg)                               # EUP
    xw = _mxu_dot(x, w)                                    # (n,H)
    h = dis * _mxu_dot(a_hat, dis * xw) + b
    return jnp.maximum(h, 0.0)


def _node_score(a, x):
    """HGP-SL NodeInformationScore: || (I - D^{-1/2} A D^{-1/2}) x ||_1 (no self loops),
    zero-degree guard (isolated node -> ||x||_1).  Returns (n,1)."""
    deg = jnp.sum(a, axis=1, keepdims=True)
    dis = jnp.where(deg > 0.0, jax.lax.rsqrt(jnp.maximum(deg, 1.0)), 0.0)
    prop = dis * _mxu_dot(a, dis * x)
    return jnp.sum(jnp.abs(x - prop), axis=1, keepdims=True)


def _pool(a, x, score_col, keep):
    """Keep top-`keep` nodes by score, gate kept features with tanh(score), induced subgraph.
    Ranking via pairwise compare + reduce; gathers via one-hot matmuls on the MXU."""
    n = a.shape[0]
    ii = jax.lax.broadcasted_iota(jnp.int32, (n, n), 0)     # target node i (sublanes)
    jj = jax.lax.broadcasted_iota(jnp.int32, (n, n), 1)     # other node j (lanes)
    s_row = _col_to_row(score_col)                          # (1,n)
    # rank_i = #{ j : s_j > s_i  or (s_j == s_i and j < i) }  -> unique in 0..n-1
    gt = (s_row > score_col) | ((s_row == score_col) & (jj < ii))
    rank_col = jnp.sum(gt.astype(jnp.float32), axis=1, keepdims=True)   # (n,1)
    rank_row = _col_to_row(rank_col)                                    # (1,n)
    # selection matrices built purely from iota comparisons (no data transposes)
    r_iota = jax.lax.broadcasted_iota(jnp.int32, (keep, n), 0).astype(jnp.float32)
    c_iota = jax.lax.broadcasted_iota(jnp.int32, (n, keep), 1).astype(jnp.float32)
    p = jnp.where(r_iota == rank_row, 1.0, 0.0)             # (keep,n): P[r,i] = [rank_i == r]
    pt = jnp.where(rank_col == c_iota, 1.0, 0.0)            # (n,keep): Pᵀ without a transpose
    gate_row = jnp.tanh(s_row)                              # (1,n) EUP
    x_new = _mxu_dot(p * gate_row, x)                       # (keep,H) gated row gather
    a_new = _mxu_dot(_mxu_dot(p, a), pt)                    # (keep,keep) induced subgraph
    return a_new, x_new


def _readout(x):
    """concat(global_max_pool, global_mean_pool) over the node axis -> (1, 2H)."""
    mx = jnp.max(x, axis=0, keepdims=True)
    mean = jnp.sum(x, axis=0, keepdims=True) * (1.0 / x.shape[0])
    return jnp.concatenate([mx, mean], axis=1)


# --------------------------------------------------------------------- fully fused kernel

def hgpsl_kernel(a_ref, x_ref,
                 lw_ref, lb_ref, c1w_ref, c1b_ref, c2w_ref, c2b_ref, c3w_ref, c3b_ref,
                 f1w_ref, f1b_ref, f2w_ref, f2b_ref, f3w_ref, f3b_ref,
                 o_ref, *, keep1, keep2):
    a = a_ref[0]                                            # (n, n) binary adjacency
    x = x_ref[0]                                            # (n, F) node features

    # lin1 + relu  (num_features <= 100 branch: aa_num = 0)
    h = jnp.maximum(_mxu_dot(x, lw_ref[...]) + lb_ref[...], 0.0)
    # conv1 (GCNConv) + relu
    x1 = _gcn_relu(a, h, c1w_ref[...], c1b_ref[...])
    # pool1 (HGP-SL): node-information score -> top-k -> gate -> induced subgraph
    a1, x1p = _pool(a, x1, _node_score(a, x1), keep1)
    ro1 = _readout(x1p)
    # conv2 (GCN) + relu
    x2 = _gcn_relu(a1, x1p, c2w_ref[...], c2b_ref[...])
    # pool2
    a2, x2p = _pool(a1, x2, _node_score(a1, x2), keep2)
    ro2 = _readout(x2p)
    # conv3 (GCN) + relu
    x3 = _gcn_relu(a2, x2p, c3w_ref[...], c3b_ref[...])
    ro3 = _readout(x3)

    # relu-sum of readouts + MLP head (dropout = identity at inference) + log_softmax
    xs = jnp.maximum(ro1, 0.0) + jnp.maximum(ro2, 0.0) + jnp.maximum(ro3, 0.0)
    h1 = jnp.maximum(_mxu_dot(xs, f1w_ref[...]) + f1b_ref[...], 0.0)
    h2 = jnp.maximum(_mxu_dot(h1, f2w_ref[...]) + f2b_ref[...], 0.0)
    logits = _mxu_dot(h2, f3w_ref[...]) + f3b_ref[...]
    m = jnp.max(logits, axis=1, keepdims=True)
    z = logits - m
    o_ref[0] = z - jnp.log(jnp.sum(jnp.exp(z), axis=1, keepdims=True))


# --------------------------------------------------------------------- pallas_call wrapper

def _graph_spec(shape):
    """Block = one graph along the leading axis, full extent on the last two dims."""
    nd = len(shape)
    return pl.BlockSpec((1,) + tuple(shape[1:]), lambda g: (g,) + (0,) * (nd - 1))


def _full_spec(shape):
    """Full-array block (weights/biases), constant index -> resident in VMEM."""
    nd = len(shape)
    return pl.BlockSpec(tuple(shape), lambda g: (0,) * nd)


_WEIGHT_KEYS = ("lin1_w", "lin1_b", "conv1_w", "conv1_b", "conv2_w", "conv2_b",
                "conv3_w", "conv3_b", "fc1_w", "fc1_b", "fc2_w", "fc2_b", "fc3_w", "fc3_b")


def _cost_estimate(B, n, F, H, k1, k2, out_dim, weight_bytes):
    per_graph = (
        n * F * H                                   # lin1
        + n * H * H + n * n * H                     # conv1
        + n * n * H                                 # score1
        + k1 * n * H + k1 * n * n + k1 * n * k1     # pool1 gathers
        + k1 * H * H + k1 * k1 * H                  # conv2
        + k1 * k1 * H                               # score2
        + k2 * k1 * H + k2 * k1 * k1 + k2 * k1 * k2 # pool2 gathers
        + k2 * H * H + k2 * k2 * H                  # conv3
        + 2 * H * H + H * (H // 2) + (H // 2) * out_dim   # MLP head
    )
    flops = 2 * B * per_graph
    transcendentals = B * (3 * n + 2 * k1 + k2 + out_dim)   # rsqrt + tanh + exp, rough
    bytes_accessed = 4 * (B * n * n + B * n * F + B * out_dim) + weight_bytes
    return pl.CostEstimate(flops=int(flops), transcendentals=int(transcendentals),
                           bytes_accessed=int(bytes_accessed))


def hgpsl_forward(x, a, params, pool_ratio=0.5):
    B, n, F = x.shape
    H = params["conv1_w"].shape[1]
    out_dim = params["fc3_w"].shape[1]
    keep1 = int(math.ceil(pool_ratio * n))
    keep2 = int(math.ceil(pool_ratio * keep1))

    weights = [params[k] for k in _WEIGHT_KEYS]
    weight_bytes = int(sum(w.size for w in weights)) * 4

    kernel = functools.partial(hgpsl_kernel, keep1=keep1, keep2=keep2)

    out = pl.pallas_call(
        kernel,
        grid=(B,),
        in_specs=[_graph_spec(a.shape), _graph_spec(x.shape)]
                 + [_full_spec(w.shape) for w in weights],
        out_specs=_graph_spec((B, 1, out_dim)),
        out_shape=jax.ShapeDtypeStruct((B, 1, out_dim), jnp.float32),
        compiler_params=pltpu.CompilerParams(dimension_semantics=("parallel",)),
        cost_estimate=_cost_estimate(B, n, F, H, keep1, keep2, out_dim, weight_bytes),
    )(a, x, *weights)
    return out[:, 0, :]


# --------------------------------------------------------------------- setup

def _init_params(key, num_features, hidden_dim, output_dim):
    def lin(k, fan_in, fan_out):
        kw, kb = jax.random.split(k)
        scale = 1.0 / math.sqrt(fan_in)
        w = jax.random.uniform(kw, (fan_in, fan_out), jnp.float32, -scale, scale)
        b = jax.random.uniform(kb, (1, fan_out), jnp.float32, -scale, scale)
        return w, b

    keys = jax.random.split(key, 7)
    p = {}
    p["lin1_w"], p["lin1_b"] = lin(keys[0], num_features, hidden_dim)
    p["conv1_w"], p["conv1_b"] = lin(keys[1], hidden_dim, hidden_dim)
    p["conv2_w"], p["conv2_b"] = lin(keys[2], hidden_dim, hidden_dim)
    p["conv3_w"], p["conv3_b"] = lin(keys[3], hidden_dim, hidden_dim)
    p["fc1_w"], p["fc1_b"] = lin(keys[4], 2 * hidden_dim, hidden_dim)
    p["fc2_w"], p["fc2_b"] = lin(keys[5], hidden_dim, hidden_dim // 2)
    p["fc3_w"], p["fc3_b"] = lin(keys[6], hidden_dim // 2, output_dim)
    return p


def _build_graph_adj(num_graphs, nodes_per_graph):
    """Per-graph ring + skip-3 adjacency, binary, symmetric, no self loops: (B, n, n)."""
    n = nodes_per_graph
    idx = jnp.arange(n)
    blk = jnp.zeros((n, n), jnp.float32)
    blk = blk.at[idx, (idx + 1) % n].set(1.0)
    blk = blk.at[(idx + 1) % n, idx].set(1.0)
    blk = blk.at[idx, (idx + 3) % n].set(1.0)
    blk = blk.at[(idx + 3) % n, idx].set(1.0)
    return jnp.broadcast_to(blk, (num_graphs, n, n))


if __name__ == "__main__":
    # Small shapes: num_features=48 (<=100 branch, aa_num=0), hidden_dim=32, output_dim=2,
    # 2 graphs of 8 nodes each, pool_ratio=0.5.
    NUM_FEATURES, HIDDEN, OUT_DIM = 48, 32, 2
    NUM_GRAPHS, NODES_PER_GRAPH = 2, 8

    key = jax.random.PRNGKey(0)
    k_x, k_p = jax.random.split(key)

    x = jax.random.normal(k_x, (NUM_GRAPHS, NODES_PER_GRAPH, NUM_FEATURES), jnp.float32)
    a = _build_graph_adj(NUM_GRAPHS, NODES_PER_GRAPH)
    params = _init_params(k_p, NUM_FEATURES, HIDDEN, OUT_DIM)

    out = hgpsl_forward(x, a, params, pool_ratio=0.5)
    out = jax.block_until_ready(out)
    assert out.shape == (NUM_GRAPHS, OUT_DIM)
    assert bool(jnp.all(jnp.isfinite(out)))
    print("KERNEL_OK")
</pallas_src>

<mosaic_0001>
module attributes {stable_mosaic.version = 11 : i64} {
  func.func @hgpsl_kernel(%arg0: i32, %arg1: memref<1x8x8xf32, #tpu.memory_space<vmem>>, %arg2: memref<1x8x48xf32, #tpu.memory_space<vmem>>, %arg3: memref<48x32xf32, #tpu.memory_space<vmem>>, %arg4: memref<1x32xf32, #tpu.memory_space<vmem>>, %arg5: memref<32x32xf32, #tpu.memory_space<vmem>>, %arg6: memref<1x32xf32, #tpu.memory_space<vmem>>, %arg7: memref<32x32xf32, #tpu.memory_space<vmem>>, %arg8: memref<1x32xf32, #tpu.memory_space<vmem>>, %arg9: memref<32x32xf32, #tpu.memory_space<vmem>>, %arg10: memref<1x32xf32, #tpu.memory_space<vmem>>, %arg11: memref<64x32xf32, #tpu.memory_space<vmem>>, %arg12: memref<1x32xf32, #tpu.memory_space<vmem>>, %arg13: memref<32x16xf32, #tpu.memory_space<vmem>>, %arg14: memref<1x16xf32, #tpu.memory_space<vmem>>, %arg15: memref<16x2xf32, #tpu.memory_space<vmem>>, %arg16: memref<1x2xf32, #tpu.memory_space<vmem>>, %arg17: memref<1x1x2xf32, #tpu.memory_space<vmem>>) attributes {dimension_semantics = [#tpu.dimension_semantics<parallel>], iteration_bounds = array<i64: 2>, scalar_prefetch = 0 : i64, scratch_operands = 0 : i64, tpu.core_type = #tpu.core_type<tc>, window_params = [{transform_indices = @transform_0, window_bounds = array<i64: 1, 8, 8>}, {transform_indices = @transform_1, window_bounds = array<i64: 1, 8, 48>}, {pipeline_mode = #tpu.pipeline_mode<synchronous>, transform_indices = @transform_2, window_bounds = array<i64: 48, 32>}, {pipeline_mode = #tpu.pipeline_mode<synchronous>, transform_indices = @transform_3, window_bounds = array<i64: 1, 32>}, {pipeline_mode = #tpu.pipeline_mode<synchronous>, transform_indices = @transform_4, window_bounds = array<i64: 32, 32>}, {pipeline_mode = #tpu.pipeline_mode<synchronous>, transform_indices = @transform_5, window_bounds = array<i64: 1, 32>}, {pipeline_mode = #tpu.pipeline_mode<synchronous>, transform_indices = @transform_6, window_bounds = array<i64: 32, 32>}, {pipeline_mode = #tpu.pipeline_mode<synchronous>, transform_indices = @transform_7, window_bounds = array<i64: 1, 32>}, {pipeline_mode = #tpu.pipeline_mode<synchronous>, transform_indices = @transform_8, window_bounds = array<i64: 32, 32>}, {pipeline_mode = #tpu.pipeline_mode<synchronous>, transform_indices = @transform_9, window_bounds = array<i64: 1, 32>}, {pipeline_mode = #tpu.pipeline_mode<synchronous>, transform_indices = @transform_10, window_bounds = array<i64: 64, 32>}, {pipeline_mode = #tpu.pipeline_mode<synchronous>, transform_indices = @transform_11, window_bounds = array<i64: 1, 32>}, {pipeline_mode = #tpu.pipeline_mode<synchronous>, transform_indices = @transform_12, window_bounds = array<i64: 32, 16>}, {pipeline_mode = #tpu.pipeline_mode<synchronous>, transform_indices = @transform_13, window_bounds = array<i64: 1, 16>}, {pipeline_mode = #tpu.pipeline_mode<synchronous>, transform_indices = @transform_14, window_bounds = array<i64: 16, 2>}, {pipeline_mode = #tpu.pipeline_mode<synchronous>, transform_indices = @transform_15, window_bounds = array<i64: 1, 2>}, {transform_indices = @transform_16, window_bounds = array<i64: 1, 1, 2>}]} {
    %c0 = arith.constant 0 : index
    %c0_0 = arith.constant 0 : index
    %c0_1 = arith.constant 0 : index
    %0 = vector.load %arg1[%c0, %c0_0, %c0_1] : memref<1x8x8xf32, #tpu.memory_space<vmem>>, vector<1x8x8xf32>
    %1 = vector.shape_cast %0 : vector<1x8x8xf32> to vector<8x8xf32>
    %c0_2 = arith.constant 0 : index
    %c0_3 = arith.constant 0 : index
    %c0_4 = arith.constant 0 : index
    %2 = vector.load %arg2[%c0_2, %c0_3, %c0_4] : memref<1x8x48xf32, #tpu.memory_space<vmem>>, vector<1x8x48xf32>
    %3 = vector.shape_cast %2 : vector<1x8x48xf32> to vector<8x48xf32>
    %c0_5 = arith.constant 0 : index
    %c0_6 = arith.constant 0 : index
    %4 = vector.load %arg3[%c0_5, %c0_6] : memref<48x32xf32, #tpu.memory_space<vmem>>, vector<48x32xf32>
    %5 = arith.truncf %3 : vector<8x48xf32> to vector<8x48xbf16>
    %6 = arith.truncf %4 : vector<48x32xf32> to vector<48x32xbf16>
    %cst = arith.constant dense<0.000000e+00> : vector<8x32xf32>
    %7 = tpu.matmul %5, %6, %cst {dimension_numbers = #tpu.dot_dimension_numbers<[1], [0], [0], [1], [0, 0, 1, 1], [], []>} : vector<8x48xbf16>, vector<48x32xbf16>, vector<8x32xf32> -> vector<8x32xf32>
    %c0_7 = arith.constant 0 : index
    %c0_8 = arith.constant 0 : index
    %8 = vector.load %arg4[%c0_7, %c0_8] : memref<1x32xf32, #tpu.memory_space<vmem>>, vector<1x32xf32>
    %9 = vector.broadcast %8 : vector<1x32xf32> to vector<8x32xf32>
    %10 = arith.addf %7, %9 : vector<8x32xf32>
    %cst_9 = arith.constant 0.000000e+00 : f32
    %11 = vector.broadcast %cst_9 : f32 to vector<8x32xf32>
    %12 = arith.maximumf %10, %11 : vector<8x32xf32>
    %c0_10 = arith.constant 0 : index
    %c0_11 = arith.constant 0 : index
    %13 = vector.load %arg5[%c0_10, %c0_11] : memref<32x32xf32, #tpu.memory_space<vmem>>, vector<32x32xf32>
    %c0_12 = arith.constant 0 : index
    %c0_13 = arith.constant 0 : index
    %14 = vector.load %arg6[%c0_12, %c0_13] : memref<1x32xf32, #tpu.memory_space<vmem>>, vector<1x32xf32>
    %15 = tpu.iota {dimensions = array<i32: 0>} : vector<8x8xi32>
    %16 = tpu.iota {dimensions = array<i32: 1>} : vector<8x8xi32>
    %17 = arith.cmpi eq, %15, %16 : vector<8x8xi32>
    %cst_14 = arith.constant 1.000000e+00 : f32
    %cst_15 = arith.constant 0.000000e+00 : f32
    %18 = vector.broadcast %cst_14 : f32 to vector<8x8xf32>
    %19 = vector.broadcast %cst_15 : f32 to vector<8x8xf32>
    %20 = arith.select %17, %18, %19 : vector<8x8xi1>, vector<8x8xf32>
    %21 = arith.addf %1, %20 : vector<8x8xf32>
    %cst_16 = arith.constant dense<0.000000e+00> : vector<8xf32>
    %22 = vector.multi_reduction <add>, %21, %cst_16 [1] : vector<8x8xf32> to vector<8xf32>
    %23 = vector.shape_cast %22 : vector<8xf32> to vector<8x1xf32>
    %24 = math.rsqrt %23 : vector<8x1xf32>
    %25 = arith.truncf %12 : vector<8x32xf32> to vector<8x32xbf16>
    %26 = arith.truncf %13 : vector<32x32xf32> to vector<32x32xbf16>
    %cst_17 = arith.constant dense<0.000000e+00> : vector<8x32xf32>
    %27 = tpu.matmul %25, %26, %cst_17 {dimension_numbers = #tpu.dot_dimension_numbers<[1], [0], [0], [1], [0, 0, 1, 1], [], []>} : vector<8x32xbf16>, vector<32x32xbf16>, vector<8x32xf32> -> vector<8x32xf32>
    %28 = vector.broadcast %24 : vector<8x1xf32> to vector<8x32xf32>
    %29 = arith.mulf %28, %27 : vector<8x32xf32>
    %30 = arith.truncf %21 : vector<8x8xf32> to vector<8x8xbf16>
    %31 = arith.truncf %29 : vector<8x32xf32> to vector<8x32xbf16>
    %cst_18 = arith.constant dense<0.000000e+00> : vector<8x32xf32>
    %32 = tpu.matmul %30, %31, %cst_18 {dimension_numbers = #tpu.dot_dimension_numbers<[1], [0], [0], [1], [0, 0, 1, 1], [], []>} : vector<8x8xbf16>, vector<8x32xbf16>, vector<8x32xf32> -> vector<8x32xf32>
    %33 = vector.broadcast %24 : vector<8x1xf32> to vector<8x32xf32>
    %34 = arith.mulf %33, %32 : vector<8x32xf32>
    %35 = vector.broadcast %14 : vector<1x32xf32> to vector<8x32xf32>
    %36 = arith.addf %34, %35 : vector<8x32xf32>
    %cst_19 = arith.constant 0.000000e+00 : f32
    %37 = vector.broadcast %cst_19 : f32 to vector<8x32xf32>
    %38 = arith.maximumf %36, %37 : vector<8x32xf32>
    %cst_20 = arith.constant dense<0.000000e+00> : vector<8xf32>
    %39 = vector.multi_reduction <add>, %1, %cst_20 [1] : vector<8x8xf32> to vector<8xf32>
    %40 = vector.shape_cast %39 : vector<8xf32> to vector<8x1xf32>
    %cst_21 = arith.constant 0.000000e+00 : f32
    %41 = vector.broadcast %cst_21 : f32 to vector<8x1xf32>
    %42 = arith.cmpf ogt, %40, %41 : vector<8x1xf32>
    %cst_22 = arith.constant 1.000000e+00 : f32
    %43 = vector.broadcast %cst_22 : f32 to vector<8x1xf32>
    %44 = arith.maximumf %40, %43 : vector<8x1xf32>
    %45 = math.rsqrt %44 : vector<8x1xf32>
    %cst_23 = arith.constant 0.000000e+00 : f32
    %46 = vector.broadcast %cst_23 : f32 to vector<8x1xf32>
    %47 = arith.select %42, %45, %46 : vector<8x1xi1>, vector<8x1xf32>
    %48 = vector.broadcast %47 : vector<8x1xf32> to vector<8x32xf32>
    %49 = arith.mulf %48, %38 : vector<8x32xf32>
    %50 = arith.truncf %1 : vector<8x8xf32> to vector<8x8xbf16>
    %51 = arith.truncf %49 : vector<8x32xf32> to vector<8x32xbf16>
    %cst_24 = arith.constant dense<0.000000e+00> : vector<8x32xf32>
    %52 = tpu.matmul %50, %51, %cst_24 {dimension_numbers = #tpu.dot_dimension_numbers<[1], [0], [0], [1], [0, 0, 1, 1], [], []>} : vector<8x8xbf16>, vector<8x32xbf16>, vector<8x32xf32> -> vector<8x32xf32>
    %53 = vector.broadcast %47 : vector<8x1xf32> to vector<8x32xf32>
    %54 = arith.mulf %53, %52 : vector<8x32xf32>
    %55 = arith.subf %38, %54 : vector<8x32xf32>
    %56 = math.absf %55 : vector<8x32xf32>
    %cst_25 = arith.constant dense<0.000000e+00> : vector<8xf32>
    %57 = vector.multi_reduction <add>, %56, %cst_25 [1] : vector<8x32xf32> to vector<8xf32>
    %58 = vector.shape_cast %57 : vector<8xf32> to vector<8x1xf32>
    %59 = tpu.iota {dimensions = array<i32: 0>} : vector<8x8xi32>
    %60 = tpu.iota {dimensions = array<i32: 1>} : vector<8x8xi32>
    %61 = tpu.iota {dimensions = array<i32: 0>} : vector<8x8xi32>
    %62 = tpu.iota {dimensions = array<i32: 1>} : vector<8x8xi32>
    %63 = arith.cmpi eq, %61, %62 : vector<8x8xi32>
    %cst_26 = arith.constant 0.000000e+00 : f32
    %64 = vector.shape_cast %58 : vector<8x1xf32> to vector<8x1xf32>
    %65 = vector.broadcast %64 : vector<8x1xf32> to vector<8x8xf32>
    %66 = vector.broadcast %cst_26 : f32 to vector<8x8xf32>
    %67 = arith.select %63, %65, %66 : vector<8x8xi1>, vector<8x8xf32>
    %cst_27 = arith.constant dense<0.000000e+00> : vector<8xf32>
    %68 = vector.multi_reduction <add>, %67, %cst_27 [0] : vector<8x8xf32> to vector<8xf32>
    %69 = vector.shape_cast %68 : vector<8xf32> to vector<1x8xf32>
    %70 = vector.broadcast %69 : vector<1x8xf32> to vector<8x8xf32>
    %71 = vector.broadcast %58 : vector<8x1xf32> to vector<8x8xf32>
    %72 = arith.cmpf ogt, %70, %71 : vector<8x8xf32>
    %73 = vector.broadcast %69 : vector<1x8xf32> to vector<8x8xf32>
    %74 = vector.broadcast %58 : vector<8x1xf32> to vector<8x8xf32>
    %75 = arith.cmpf oeq, %73, %74 : vector<8x8xf32>
    %76 = arith.cmpi slt, %60, %59 : vector<8x8xi32>
    %77 = arith.andi %75, %76 : vector<8x8xi1>
    %78 = arith.ori %72, %77 : vector<8x8xi1>
    %79 = arith.extui %78 : vector<8x8xi1> to vector<8x8xi32>
    %80 = arith.sitofp %79 : vector<8x8xi32> to vector<8x8xf32>
    %cst_28 = arith.constant dense<0.000000e+00> : vector<8xf32>
    %81 = vector.multi_reduction <add>, %80, %cst_28 [1] : vector<8x8xf32> to vector<8xf32>
    %82 = vector.shape_cast %81 : vector<8xf32> to vector<8x1xf32>
    %83 = tpu.iota {dimensions = array<i32: 0>} : vector<8x8xi32>
    %84 = tpu.iota {dimensions = array<i32: 1>} : vector<8x8xi32>
    %85 = arith.cmpi eq, %83, %84 : vector<8x8xi32>
    %cst_29 = arith.constant 0.000000e+00 : f32
    %86 = vector.shape_cast %82 : vector<8x1xf32> to vector<8x1xf32>
    %87 = vector.broadcast %86 : vector<8x1xf32> to vector<8x8xf32>
    %88 = vector.broadcast %cst_29 : f32 to vector<8x8xf32>
    %89 = arith.select %85, %87, %88 : vector<8x8xi1>, vector<8x8xf32>
    %cst_30 = arith.constant dense<0.000000e+00> : vector<8xf32>
    %90 = vector.multi_reduction <add>, %89, %cst_30 [0] : vector<8x8xf32> to vector<8xf32>
    %91 = vector.shape_cast %90 : vector<8xf32> to vector<1x8xf32>
    %92 = tpu.iota {dimensions = array<i32: 0>} : vector<4x8xi32>
    %93 = arith.sitofp %92 : vector<4x8xi32> to vector<4x8xf32>
    %94 = tpu.iota {dimensions = array<i32: 1>} : vector<8x4xi32>
    %95 = arith.sitofp %94 : vector<8x4xi32> to vector<8x4xf32>
    %96 = vector.broadcast %91 : vector<1x8xf32> to vector<4x8xf32>
    %97 = arith.cmpf oeq, %93, %96 : vector<4x8xf32>
    %cst_31 = arith.constant 1.000000e+00 : f32
    %cst_32 = arith.constant 0.000000e+00 : f32
    %98 = vector.broadcast %cst_31 : f32 to vector<4x8xf32>
    %99 = vector.broadcast %cst_32 : f32 to vector<4x8xf32>
    %100 = arith.select %97, %98, %99 : vector<4x8xi1>, vector<4x8xf32>
    %101 = vector.broadcast %82 : vector<8x1xf32> to vector<8x4xf32>
    %102 = arith.cmpf oeq, %101, %95 : vector<8x4xf32>
    %cst_33 = arith.constant 1.000000e+00 : f32
    %cst_34 = arith.constant 0.000000e+00 : f32
    %103 = vector.broadcast %cst_33 : f32 to vector<8x4xf32>
    %104 = vector.broadcast %cst_34 : f32 to vector<8x4xf32>
    %105 = arith.select %102, %103, %104 : vector<8x4xi1>, vector<8x4xf32>
    %106 = math.tanh %69 : vector<1x8xf32>
    %107 = vector.broadcast %106 : vector<1x8xf32> to vector<4x8xf32>
    %108 = arith.mulf %100, %107 : vector<4x8xf32>
    %109 = arith.truncf %108 : vector<4x8xf32> to vector<4x8xbf16>
    %110 = arith.truncf %38 : vector<8x32xf32> to vector<8x32xbf16>
    %cst_35 = arith.constant dense<0.000000e+00> : vector<4x32xf32>
    %111 = tpu.matmul %109, %110, %cst_35 {dimension_numbers = #tpu.dot_dimension_numbers<[1], [0], [0], [1], [0, 0, 1, 1], [], []>} : vector<4x8xbf16>, vector<8x32xbf16>, vector<4x32xf32> -> vector<4x32xf32>
    %112 = arith.truncf %100 : vector<4x8xf32> to vector<4x8xbf16>
    %113 = arith.truncf %1 : vector<8x8xf32> to vector<8x8xbf16>
    %cst_36 = arith.constant dense<0.000000e+00> : vector<4x8xf32>
    %114 = tpu.matmul %112, %113, %cst_36 {dimension_numbers = #tpu.dot_dimension_numbers<[1], [0], [0], [1], [0, 0, 1, 1], [], []>} : vector<4x8xbf16>, vector<8x8xbf16>, vector<4x8xf32> -> vector<4x8xf32>
    %115 = arith.truncf %114 : vector<4x8xf32> to vector<4x8xbf16>
    %116 = arith.truncf %105 : vector<8x4xf32> to vector<8x4xbf16>
    %cst_37 = arith.constant dense<0.000000e+00> : vector<4x4xf32>
    %117 = tpu.matmul %115, %116, %cst_37 {dimension_numbers = #tpu.dot_dimension_numbers<[1], [0], [0], [1], [0, 0, 1, 1], [], []>} : vector<4x8xbf16>, vector<8x4xbf16>, vector<4x4xf32> -> vector<4x4xf32>
    %cst_38 = arith.constant dense<0xFF800000> : vector<32xf32>
    %118 = vector.multi_reduction <maximumf>, %111, %cst_38 [0] : vector<4x32xf32> to vector<32xf32>
    %119 = vector.shape_cast %118 : vector<32xf32> to vector<1x32xf32>
    %cst_39 = arith.constant dense<0.000000e+00> : vector<32xf32>
    %120 = vector.multi_reduction <add>, %111, %cst_39 [0] : vector<4x32xf32> to vector<32xf32>
    %121 = vector.shape_cast %120 : vector<32xf32> to vector<1x32xf32>
    %cst_40 = arith.constant 2.500000e-01 : f32
    %122 = vector.broadcast %cst_40 : f32 to vector<1x32xf32>
    %123 = arith.mulf %121, %122 : vector<1x32xf32>
    %124 = tpu.concatenate %119, %123 in 1 : vector<1x32xf32>, vector<1x32xf32> -> vector<1x64xf32>
    %c0_41 = arith.constant 0 : index
    %c0_42 = arith.constant 0 : index
    %125 = vector.load %arg7[%c0_41, %c0_42] : memref<32x32xf32, #tpu.memory_space<vmem>>, vector<32x32xf32>
    %c0_43 = arith.constant 0 : index
    %c0_44 = arith.constant 0 : index
    %126 = vector.load %arg8[%c0_43, %c0_44] : memref<1x32xf32, #tpu.memory_space<vmem>>, vector<1x32xf32>
    %127 = tpu.iota {dimensions = array<i32: 0>} : vector<4x4xi32>
    %128 = tpu.iota {dimensions = array<i32: 1>} : vector<4x4xi32>
    %129 = arith.cmpi eq, %127, %128 : vector<4x4xi32>
    %cst_45 = arith.constant 1.000000e+00 : f32
    %cst_46 = arith.constant 0.000000e+00 : f32
    %130 = vector.broadcast %cst_45 : f32 to vector<4x4xf32>
    %131 = vector.broadcast %cst_46 : f32 to vector<4x4xf32>
    %132 = arith.select %129, %130, %131 : vector<4x4xi1>, vector<4x4xf32>
    %133 = arith.addf %117, %132 : vector<4x4xf32>
    %cst_47 = arith.constant dense<0.000000e+00> : vector<4xf32>
    %134 = vector.multi_reduction <add>, %133, %cst_47 [1] : vector<4x4xf32> to vector<4xf32>
    %135 = vector.shape_cast %134 : vector<4xf32> to vector<4x1xf32>
    %136 = math.rsqrt %135 : vector<4x1xf32>
    %137 = arith.truncf %111 : vector<4x32xf32> to vector<4x32xbf16>
    %138 = arith.truncf %125 : vector<32x32xf32> to vector<32x32xbf16>
    %cst_48 = arith.constant dense<0.000000e+00> : vector<4x32xf32>
    %139 = tpu.matmul %137, %138, %cst_48 {dimension_numbers = #tpu.dot_dimension_numbers<[1], [0], [0], [1], [0, 0, 1, 1], [], []>} : vector<4x32xbf16>, vector<32x32xbf16>, vector<4x32xf32> -> vector<4x32xf32>
    %140 = vector.broadcast %136 : vector<4x1xf32> to vector<4x32xf32>
    %141 = arith.mulf %140, %139 : vector<4x32xf32>
    %142 = arith.truncf %133 : vector<4x4xf32> to vector<4x4xbf16>
    %143 = arith.truncf %141 : vector<4x32xf32> to vector<4x32xbf16>
    %cst_49 = arith.constant dense<0.000000e+00> : vector<4x32xf32>
    %144 = tpu.matmul %142, %143, %cst_49 {dimension_numbers = #tpu.dot_dimension_numbers<[1], [0], [0], [1], [0, 0, 1, 1], [], []>} : vector<4x4xbf16>, vector<4x32xbf16>, vector<4x32xf32> -> vector<4x32xf32>
    %145 = vector.broadcast %136 : vector<4x1xf32> to vector<4x32xf32>
    %146 = arith.mulf %145, %144 : vector<4x32xf32>
    %147 = vector.broadcast %126 : vector<1x32xf32> to vector<4x32xf32>
    %148 = arith.addf %146, %147 : vector<4x32xf32>
    %cst_50 = arith.constant 0.000000e+00 : f32
    %149 = vector.broadcast %cst_50 : f32 to vector<4x32xf32>
    %150 = arith.maximumf %148, %149 : vector<4x32xf32>
    %cst_51 = arith.constant dense<0.000000e+00> : vector<4xf32>
    %151 = vector.multi_reduction <add>, %117, %cst_51 [1] : vector<4x4xf32> to vector<4xf32>
    %152 = vector.shape_cast %151 : vector<4xf32> to vector<4x1xf32>
    %cst_52 = arith.constant 0.000000e+00 : f32
    %153 = vector.broadcast %cst_52 : f32 to vector<4x1xf32>
    %154 = arith.cmpf ogt, %152, %153 : vector<4x1xf32>
    %cst_53 = arith.constant 1.000000e+00 : f32
    %155 = vector.broadcast %cst_53 : f32 to vector<4x1xf32>
    %156 = arith.maximumf %152, %155 : vector<4x1xf32>
    %157 = math.rsqrt %156 : vector<4x1xf32>
    %cst_54 = arith.constant 0.000000e+00 : f32
    %158 = vector.broadcast %cst_54 : f32 to vector<4x1xf32>
    %159 = arith.select %154, %157, %158 : vector<4x1xi1>, vector<4x1xf32>
    %160 = vector.broadcast %159 : vector<4x1xf32> to vector<4x32xf32>
    %161 = arith.mulf %160, %150 : vector<4x32xf32>
    %162 = arith.truncf %117 : vector<4x4xf32> to vector<4x4xbf16>
    %163 = arith.truncf %161 : vector<4x32xf32> to vector<4x32xbf16>
    %cst_55 = arith.constant dense<0.000000e+00> : vector<4x32xf32>
    %164 = tpu.matmul %162, %163, %cst_55 {dimension_numbers = #tpu.dot_dimension_numbers<[1], [0], [0], [1], [0, 0, 1, 1], [], []>} : vector<4x4xbf16>, vector<4x32xbf16>, vector<4x32xf32> -> vector<4x32xf32>
    %165 = vector.broadcast %159 : vector<4x1xf32> to vector<4x32xf32>
    %166 = arith.mulf %165, %164 : vector<4x32xf32>
    %167 = arith.subf %150, %166 : vector<4x32xf32>
    %168 = math.absf %167 : vector<4x32xf32>
    %cst_56 = arith.constant dense<0.000000e+00> : vector<4xf32>
    %169 = vector.multi_reduction <add>, %168, %cst_56 [1] : vector<4x32xf32> to vector<4xf32>
    %170 = vector.shape_cast %169 : vector<4xf32> to vector<4x1xf32>
    %171 = tpu.iota {dimensions = array<i32: 0>} : vector<4x4xi32>
    %172 = tpu.iota {dimensions = array<i32: 1>} : vector<4x4xi32>
    %173 = tpu.iota {dimensions = array<i32: 0>} : vector<4x4xi32>
    %174 = tpu.iota {dimensions = array<i32: 1>} : vector<4x4xi32>
    %175 = arith.cmpi eq, %173, %174 : vector<4x4xi32>
    %cst_57 = arith.constant 0.000000e+00 : f32
    %176 = vector.shape_cast %170 : vector<4x1xf32> to vector<4x1xf32>
    %177 = vector.broadcast %176 : vector<4x1xf32> to vector<4x4xf32>
    %178 = vector.broadcast %cst_57 : f32 to vector<4x4xf32>
    %179 = arith.select %175, %177, %178 : vector<4x4xi1>, vector<4x4xf32>
    %cst_58 = arith.constant dense<0.000000e+00> : vector<4xf32>
    %180 = vector.multi_reduction <add>, %179, %cst_58 [0] : vector<4x4xf32> to vector<4xf32>
    %181 = vector.shape_cast %180 : vector<4xf32> to vector<1x4xf32>
    %182 = vector.broadcast %181 : vector<1x4xf32> to vector<4x4xf32>
    %183 = vector.broadcast %170 : vector<4x1xf32> to vector<4x4xf32>
    %184 = arith.cmpf ogt, %182, %183 : vector<4x4xf32>
    %185 = vector.broadcast %181 : vector<1x4xf32> to vector<4x4xf32>
    %186 = vector.broadcast %170 : vector<4x1xf32> to vector<4x4xf32>
    %187 = arith.cmpf oeq, %185, %186 : vector<4x4xf32>
    %188 = arith.cmpi slt, %172, %171 : vector<4x4xi32>
    %189 = arith.andi %187, %188 : vector<4x4xi1>
    %190 = arith.ori %184, %189 : vector<4x4xi1>
    %191 = arith.extui %190 : vector<4x4xi1> to vector<4x4xi32>
    %192 = arith.sitofp %191 : vector<4x4xi32> to vector<4x4xf32>
    %cst_59 = arith.constant dense<0.000000e+00> : vector<4xf32>
    %193 = vector.multi_reduction <add>, %192, %cst_59 [1] : vector<4x4xf32> to vector<4xf32>
    %194 = vector.shape_cast %193 : vector<4xf32> to vector<4x1xf32>
    %195 = tpu.iota {dimensions = array<i32: 0>} : vector<4x4xi32>
    %196 = tpu.iota {dimensions = array<i32: 1>} : vector<4x4xi32>
    %197 = arith.cmpi eq, %195, %196 : vector<4x4xi32>
    %cst_60 = arith.constant 0.000000e+00 : f32
    %198 = vector.shape_cast %194 : vector<4x1xf32> to vector<4x1xf32>
    %199 = vector.broadcast %198 : vector<4x1xf32> to vector<4x4xf32>
    %200 = vector.broadcast %cst_60 : f32 to vector<4x4xf32>
    %201 = arith.select %197, %199, %200 : vector<4x4xi1>, vector<4x4xf32>
    %cst_61 = arith.constant dense<0.000000e+00> : vector<4xf32>
    %202 = vector.multi_reduction <add>, %201, %cst_61 [0] : vector<4x4xf32> to vector<4xf32>
    %203 = vector.shape_cast %202 : vector<4xf32> to vector<1x4xf32>
    %204 = tpu.iota {dimensions = array<i32: 0>} : vector<2x4xi32>
    %205 = arith.sitofp %204 : vector<2x4xi32> to vector<2x4xf32>
    %206 = tpu.iota {dimensions = array<i32: 1>} : vector<4x2xi32>
    %207 = arith.sitofp %206 : vector<4x2xi32> to vector<4x2xf32>
    %208 = vector.broadcast %203 : vector<1x4xf32> to vector<2x4xf32>
    %209 = arith.cmpf oeq, %205, %208 : vector<2x4xf32>
    %cst_62 = arith.constant 1.000000e+00 : f32
    %cst_63 = arith.constant 0.000000e+00 : f32
    %210 = vector.broadcast %cst_62 : f32 to vector<2x4xf32>
    %211 = vector.broadcast %cst_63 : f32 to vector<2x4xf32>
    %212 = arith.select %209, %210, %211 : vector<2x4xi1>, vector<2x4xf32>
    %213 = vector.broadcast %194 : vector<4x1xf32> to vector<4x2xf32>
    %214 = arith.cmpf oeq, %213, %207 : vector<4x2xf32>
    %cst_64 = arith.constant 1.000000e+00 : f32
    %cst_65 = arith.constant 0.000000e+00 : f32
    %215 = vector.broadcast %cst_64 : f32 to vector<4x2xf32>
    %216 = vector.broadcast %cst_65 : f32 to vector<4x2xf32>
    %217 = arith.select %214, %215, %216 : vector<4x2xi1>, vector<4x2xf32>
    %218 = math.tanh %181 : vector<1x4xf32>
    %219 = vector.broadcast %218 : vector<1x4xf32> to vector<2x4xf32>
    %220 = arith.mulf %212, %219 : vector<2x4xf32>
    %221 = arith.truncf %220 : vector<2x4xf32> to vector<2x4xbf16>
    %222 = arith.truncf %150 : vector<4x32xf32> to vector<4x32xbf16>
    %cst_66 = arith.constant dense<0.000000e+00> : vector<2x32xf32>
    %223 = tpu.matmul %221, %222, %cst_66 {dimension_numbers = #tpu.dot_dimension_numbers<[1], [0], [0], [1], [0, 0, 1, 1], [], []>} : vector<2x4xbf16>, vector<4x32xbf16>, vector<2x32xf32> -> vector<2x32xf32>
    %224 = arith.truncf %212 : vector<2x4xf32> to vector<2x4xbf16>
    %225 = arith.truncf %117 : vector<4x4xf32> to vector<4x4xbf16>
    %cst_67 = arith.constant dense<0.000000e+00> : vector<2x4xf32>
    %226 = tpu.matmul %224, %225, %cst_67 {dimension_numbers = #tpu.dot_dimension_numbers<[1], [0], [0], [1], [0, 0, 1, 1], [], []>} : vector<2x4xbf16>, vector<4x4xbf16>, vector<2x4xf32> -> vector<2x4xf32>
    %227 = arith.truncf %226 : vector<2x4xf32> to vector<2x4xbf16>
    %228 = arith.truncf %217 : vector<4x2xf32> to vector<4x2xbf16>
    %cst_68 = arith.constant dense<0.000000e+00> : vector<2x2xf32>
    %229 = tpu.matmul %227, %228, %cst_68 {dimension_numbers = #tpu.dot_dimension_numbers<[1], [0], [0], [1], [0, 0, 1, 1], [], []>} : vector<2x4xbf16>, vector<4x2xbf16>, vector<2x2xf32> -> vector<2x2xf32>
    %cst_69 = arith.constant dense<0xFF800000> : vector<32xf32>
    %230 = vector.multi_reduction <maximumf>, %223, %cst_69 [0] : vector<2x32xf32> to vector<32xf32>
    %231 = vector.shape_cast %230 : vector<32xf32> to vector<1x32xf32>
    %cst_70 = arith.constant dense<0.000000e+00> : vector<32xf32>
    %232 = vector.multi_reduction <add>, %223, %cst_70 [0] : vector<2x32xf32> to vector<32xf32>
    %233 = vector.shape_cast %232 : vector<32xf32> to vector<1x32xf32>
    %cst_71 = arith.constant 5.000000e-01 : f32
    %234 = vector.broadcast %cst_71 : f32 to vector<1x32xf32>
    %235 = arith.mulf %233, %234 : vector<1x32xf32>
    %236 = tpu.concatenate %231, %235 in 1 : vector<1x32xf32>, vector<1x32xf32> -> vector<1x64xf32>
    %c0_72 = arith.constant 0 : index
    %c0_73 = arith.constant 0 : index
    %237 = vector.load %arg9[%c0_72, %c0_73] : memref<32x32xf32, #tpu.memory_space<vmem>>, vector<32x32xf32>
    %c0_74 = arith.constant 0 : index
    %c0_75 = arith.constant 0 : index
    %238 = vector.load %arg10[%c0_74, %c0_75] : memref<1x32xf32, #tpu.memory_space<vmem>>, vector<1x32xf32>
    %239 = tpu.iota {dimensions = array<i32: 0>} : vector<2x2xi32>
    %240 = tpu.iota {dimensions = array<i32: 1>} : vector<2x2xi32>
    %241 = arith.cmpi eq, %239, %240 : vector<2x2xi32>
    %cst_76 = arith.constant 1.000000e+00 : f32
    %cst_77 = arith.constant 0.000000e+00 : f32
    %242 = vector.broadcast %cst_76 : f32 to vector<2x2xf32>
    %243 = vector.broadcast %cst_77 : f32 to vector<2x2xf32>
    %244 = arith.select %241, %242, %243 : vector<2x2xi1>, vector<2x2xf32>
    %245 = arith.addf %229, %244 : vector<2x2xf32>
    %cst_78 = arith.constant dense<0.000000e+00> : vector<2xf32>
    %246 = vector.multi_reduction <add>, %245, %cst_78 [1] : vector<2x2xf32> to vector<2xf32>
    %247 = vector.shape_cast %246 : vector<2xf32> to vector<2x1xf32>
    %248 = math.rsqrt %247 : vector<2x1xf32>
    %249 = arith.truncf %223 : vector<2x32xf32> to vector<2x32xbf16>
    %250 = arith.truncf %237 : vector<32x32xf32> to vector<32x32xbf16>
    %cst_79 = arith.constant dense<0.000000e+00> : vector<2x32xf32>
    %251 = tpu.matmul %249, %250, %cst_79 {dimension_numbers = #tpu.dot_dimension_numbers<[1], [0], [0], [1], [0, 0, 1, 1], [], []>} : vector<2x32xbf16>, vector<32x32xbf16>, vector<2x32xf32> -> vector<2x32xf32>
    %252 = vector.broadcast %248 : vector<2x1xf32> to vector<2x32xf32>
    %253 = arith.mulf %252, %251 : vector<2x32xf32>
    %254 = arith.truncf %245 : vector<2x2xf32> to vector<2x2xbf16>
    %255 = arith.truncf %253 : vector<2x32xf32> to vector<2x32xbf16>
    %cst_80 = arith.constant dense<0.000000e+00> : vector<2x32xf32>
    %256 = tpu.matmul %254, %255, %cst_80 {dimension_numbers = #tpu.dot_dimension_numbers<[1], [0], [0], [1], [0, 0, 1, 1], [], []>} : vector<2x2xbf16>, vector<2x32xbf16>, vector<2x32xf32> -> vector<2x32xf32>
    %257 = vector.broadcast %248 : vector<2x1xf32> to vector<2x32xf32>
    %258 = arith.mulf %257, %256 : vector<2x32xf32>
    %259 = vector.broadcast %238 : vector<1x32xf32> to vector<2x32xf32>
    %260 = arith.addf %258, %259 : vector<2x32xf32>
    %cst_81 = arith.constant 0.000000e+00 : f32
    %261 = vector.broadcast %cst_81 : f32 to vector<2x32xf32>
    %262 = arith.maximumf %260, %261 : vector<2x32xf32>
    %cst_82 = arith.constant dense<0xFF800000> : vector<32xf32>
    %263 = vector.multi_reduction <maximumf>, %262, %cst_82 [0] : vector<2x32xf32> to vector<32xf32>
    %264 = vector.shape_cast %263 : vector<32xf32> to vector<1x32xf32>
    %cst_83 = arith.constant dense<0.000000e+00> : vector<32xf32>
    %265 = vector.multi_reduction <add>, %262, %cst_83 [0] : vector<2x32xf32> to vector<32xf32>
    %266 = vector.shape_cast %265 : vector<32xf32> to vector<1x32xf32>
    %cst_84 = arith.constant 5.000000e-01 : f32
    %267 = vector.broadcast %cst_84 : f32 to vector<1x32xf32>
    %268 = arith.mulf %266, %267 : vector<1x32xf32>
    %269 = tpu.concatenate %264, %268 in 1 : vector<1x32xf32>, vector<1x32xf32> -> vector<1x64xf32>
    %cst_85 = arith.constant 0.000000e+00 : f32
    %270 = vector.broadcast %cst_85 : f32 to vector<1x64xf32>
    %271 = arith.maximumf %124, %270 : vector<1x64xf32>
    %cst_86 = arith.constant 0.000000e+00 : f32
    %272 = vector.broadcast %cst_86 : f32 to vector<1x64xf32>
    %273 = arith.maximumf %236, %272 : vector<1x64xf32>
    %274 = arith.addf %271, %273 : vector<1x64xf32>
    %cst_87 = arith.constant 0.000000e+00 : f32
    %275 = vector.broadcast %cst_87 : f32 to vector<1x64xf32>
    %276 = arith.maximumf %269, %275 : vector<1x64xf32>
    %277 = arith.addf %274, %276 : vector<1x64xf32>
    %c0_88 = arith.constant 0 : index
    %c0_89 = arith.constant 0 : index
    %278 = vector.load %arg11[%c0_88, %c0_89] : memref<64x32xf32, #tpu.memory_space<vmem>>, vector<64x32xf32>
    %279 = arith.truncf %277 : vector<1x64xf32> to vector<1x64xbf16>
    %280 = arith.truncf %278 : vector<64x32xf32> to vector<64x32xbf16>
    %cst_90 = arith.constant dense<0.000000e+00> : vector<1x32xf32>
    %281 = tpu.matmul %279, %280, %cst_90 {dimension_numbers = #tpu.dot_dimension_numbers<[1], [0], [0], [1], [0, 0, 1, 1], [], []>} : vector<1x64xbf16>, vector<64x32xbf16>, vector<1x32xf32> -> vector<1x32xf32>
    %c0_91 = arith.constant 0 : index
    %c0_92 = arith.constant 0 : index
    %282 = vector.load %arg12[%c0_91, %c0_92] : memref<1x32xf32, #tpu.memory_space<vmem>>, vector<1x32xf32>
    %283 = arith.addf %281, %282 : vector<1x32xf32>
    %cst_93 = arith.constant 0.000000e+00 : f32
    %284 = vector.broadcast %cst_93 : f32 to vector<1x32xf32>
    %285 = arith.maximumf %283, %284 : vector<1x32xf32>
    %c0_94 = arith.constant 0 : index
    %c0_95 = arith.constant 0 : index
    %286 = vector.load %arg13[%c0_94, %c0_95] : memref<32x16xf32, #tpu.memory_space<vmem>>, vector<32x16xf32>
    %287 = arith.truncf %285 : vector<1x32xf32> to vector<1x32xbf16>
    %288 = arith.truncf %286 : vector<32x16xf32> to vector<32x16xbf16>
    %cst_96 = arith.constant dense<0.000000e+00> : vector<1x16xf32>
    %289 = tpu.matmul %287, %288, %cst_96 {dimension_numbers = #tpu.dot_dimension_numbers<[1], [0], [0], [1], [0, 0, 1, 1], [], []>} : vector<1x32xbf16>, vector<32x16xbf16>, vector<1x16xf32> -> vector<1x16xf32>
    %c0_97 = arith.constant 0 : index
    %c0_98 = arith.constant 0 : index
    %290 = vector.load %arg14[%c0_97, %c0_98] : memref<1x16xf32, #tpu.memory_space<vmem>>, vector<1x16xf32>
    %291 = arith.addf %289, %290 : vector<1x16xf32>
    %cst_99 = arith.constant 0.000000e+00 : f32
    %292 = vector.broadcast %cst_99 : f32 to vector<1x16xf32>
    %293 = arith.maximumf %291, %292 : vector<1x16xf32>
    %c0_100 = arith.constant 0 : index
    %c0_101 = arith.constant 0 : index
    %294 = vector.load %arg15[%c0_100, %c0_101] : memref<16x2xf32, #tpu.memory_space<vmem>>, vector<16x2xf32>
    %295 = arith.truncf %293 : vector<1x16xf32> to vector<1x16xbf16>
    %296 = arith.truncf %294 : vector<16x2xf32> to vector<16x2xbf16>
    %cst_102 = arith.constant dense<0.000000e+00> : vector<1x2xf32>
    %297 = tpu.matmul %295, %296, %cst_102 {dimension_numbers = #tpu.dot_dimension_numbers<[1], [0], [0], [1], [0, 0, 1, 1], [], []>} : vector<1x16xbf16>, vector<16x2xbf16>, vector<1x2xf32> -> vector<1x2xf32>
    %c0_103 = arith.constant 0 : index
    %c0_104 = arith.constant 0 : index
    %298 = vector.load %arg16[%c0_103, %c0_104] : memref<1x2xf32, #tpu.memory_space<vmem>>, vector<1x2xf32>
    %299 = arith.addf %297, %298 : vector<1x2xf32>
    %cst_105 = arith.constant dense<0xFF800000> : vector<1xf32>
    %300 = vector.multi_reduction <maximumf>, %299, %cst_105 [1] : vector<1x2xf32> to vector<1xf32>
    %301 = vector.shape_cast %300 : vector<1xf32> to vector<1x1xf32>
    %302 = vector.broadcast %301 : vector<1x1xf32> to vector<1x2xf32>
    %303 = arith.subf %299, %302 : vector<1x2xf32>
    %304 = math.exp %303 : vector<1x2xf32>
    %cst_106 = arith.constant dense<0.000000e+00> : vector<1xf32>
    %305 = vector.multi_reduction <add>, %304, %cst_106 [1] : vector<1x2xf32> to vector<1xf32>
    %306 = vector.shape_cast %305 : vector<1xf32> to vector<1x1xf32>
    %307 = math.log %306 : vector<1x1xf32>
    %308 = vector.broadcast %307 : vector<1x1xf32> to vector<1x2xf32>
    %309 = arith.subf %303, %308 : vector<1x2xf32>
    %c0_107 = arith.constant 0 : index
    %c0_108 = arith.constant 0 : index
    %c0_109 = arith.constant 0 : index
    %310 = vector.load %arg17[%c0_107, %c0_108, %c0_109] : memref<1x1x2xf32, #tpu.memory_space<vmem>>, vector<1x1x2xf32>
    %311 = vector.shape_cast %310 : vector<1x1x2xf32> to vector<1x2xf32>
    %312 = vector.shape_cast %309 : vector<1x2xf32> to vector<1x1x2xf32>
    tpu.vector_store %arg17[%c0_107, %c0_108, %c0_109], %312 {strides = array<i32>} : memref<1x1x2xf32, #tpu.memory_space<vmem>>, vector<1x1x2xf32>,
    return
  }
  func.func @transform_0(%arg0: i32) -> (i32, i32, i32) {
    %c0_i32 = arith.constant 0 : i32
    %c0_i32_0 = arith.constant 0 : i32
    %c0_i32_1 = arith.constant 0 : i32
    return %arg0, %c0_i32, %c0_i32_0 : i32, i32, i32
  }
  func.func @transform_1(%arg0: i32) -> (i32, i32, i32) {
    %c0_i32 = arith.constant 0 : i32
    %c0_i32_0 = arith.constant 0 : i32
    %c0_i32_1 = arith.constant 0 : i32
    return %arg0, %c0_i32, %c0_i32_0 : i32, i32, i32
  }
  func.func @transform_2(%arg0: i32) -> (i32, i32) {
    %c0_i32 = arith.constant 0 : i32
    %c0_i32_0 = arith.constant 0 : i32
    %c0_i32_1 = arith.constant 0 : i32
    return %c0_i32, %c0_i32_0 : i32, i32
  }
  func.func @transform_3(%arg0: i32) -> (i32, i32) {
    %c0_i32 = arith.constant 0 : i32
    %c0_i32_0 = arith.constant 0 : i32
    %c0_i32_1 = arith.constant 0 : i32
    return %c0_i32, %c0_i32_0 : i32, i32
  }
  func.func @transform_4(%arg0: i32) -> (i32, i32) {
    %c0_i32 = arith.constant 0 : i32
    %c0_i32_0 = arith.constant 0 : i32
    %c0_i32_1 = arith.constant 0 : i32
    return %c0_i32, %c0_i32_0 : i32, i32
  }
  func.func @transform_5(%arg0: i32) -> (i32, i32) {
    %c0_i32 = arith.constant 0 : i32
    %c0_i32_0 = arith.constant 0 : i32
    %c0_i32_1 = arith.constant 0 : i32
    return %c0_i32, %c0_i32_0 : i32, i32
  }
  func.func @transform_6(%arg0: i32) -> (i32, i32) {
    %c0_i32 = arith.constant 0 : i32
    %c0_i32_0 = arith.constant 0 : i32
    %c0_i32_1 = arith.constant 0 : i32
    return %c0_i32, %c0_i32_0 : i32, i32
  }
  func.func @transform_7(%arg0: i32) -> (i32, i32) {
    %c0_i32 = arith.constant 0 : i32
    %c0_i32_0 = arith.constant 0 : i32
    %c0_i32_1 = arith.constant 0 : i32
    return %c0_i32, %c0_i32_0 : i32, i32
  }
  func.func @transform_8(%arg0: i32) -> (i32, i32) {
    %c0_i32 = arith.constant 0 : i32
    %c0_i32_0 = arith.constant 0 : i32
    %c0_i32_1 = arith.constant 0 : i32
    return %c0_i32, %c0_i32_0 : i32, i32
  }
  func.func @transform_9(%arg0: i32) -> (i32, i32) {
    %c0_i32 = arith.constant 0 : i32
    %c0_i32_0 = arith.constant 0 : i32
    %c0_i32_1 = arith.constant 0 : i32
    return %c0_i32, %c0_i32_0 : i32, i32
  }
  func.func @transform_10(%arg0: i32) -> (i32, i32) {
    %c0_i32 = arith.constant 0 : i32
    %c0_i32_0 = arith.constant 0 : i32
    %c0_i32_1 = arith.constant 0 : i32
    return %c0_i32, %c0_i32_0 : i32, i32
  }
  func.func @transform_11(%arg0: i32) -> (i32, i32) {
    %c0_i32 = arith.constant 0 : i32
    %c0_i32_0 = arith.constant 0 : i32
    %c0_i32_1 = arith.constant 0 : i32
    return %c0_i32, %c0_i32_0 : i32, i32
  }
  func.func @transform_12(%arg0: i32) -> (i32, i32) {
    %c0_i32 = arith.constant 0 : i32
    %c0_i32_0 = arith.constant 0 : i32
    %c0_i32_1 = arith.constant 0 : i32
    return %c0_i32, %c0_i32_0 : i32, i32
  }
  func.func @transform_13(%arg0: i32) -> (i32, i32) {
    %c0_i32 = arith.constant 0 : i32
    %c0_i32_0 = arith.constant 0 : i32
    %c0_i32_1 = arith.constant 0 : i32
    return %c0_i32, %c0_i32_0 : i32, i32
  }
  func.func @transform_14(%arg0: i32) -> (i32, i32) {
    %c0_i32 = arith.constant 0 : i32
    %c0_i32_0 = arith.constant 0 : i32
    %c0_i32_1 = arith.constant 0 : i32
    return %c0_i32, %c0_i32_0 : i32, i32
  }
  func.func @transform_15(%arg0: i32) -> (i32, i32) {
    %c0_i32 = arith.constant 0 : i32
    %c0_i32_0 = arith.constant 0 : i32
    %c0_i32_1 = arith.constant 0 : i32
    return %c0_i32, %c0_i32_0 : i32, i32
  }
  func.func @transform_16(%arg0: i32) -> (i32, i32, i32) {
    %c0_i32 = arith.constant 0 : i32
    %c0_i32_0 = arith.constant 0 : i32
    %c0_i32_1 = arith.constant 0 : i32
    return %arg0, %c0_i32, %c0_i32_0 : i32, i32, i32
  }
}

</mosaic_0001>

<bundles_post_ra>
// kernel: tpu_custom_call.1
= control target key start
LH: loop header
LB: loop body
LE: loop exit
PB: predicated region body
PF: predicated region fallthrough
CT: control target
= control target key end

     0   :  { %s2558_s0 = inlined_call_operand.vmem [shape: f32[2,8,8], index: 0, kind: input, shape index: {}]   ;;  %s2559_s1 = inlined_call_operand.vmem [shape: f32[2,8,48], index: 1, kind: input, shape index: {}]   ;;  %s2560_s2 = inlined_call_operand.vmem [shape: f32[48,32], index: 2, kind: input, shape index: {}]   ;;  %s2561_s3 = inlined_call_operand.vmem [shape: f32[1,32], index: 3, kind: input, shape index: {}]   ;;  %s2562_s4 = inlined_call_operand.vmem [shape: f32[32,32], index: 4, kind: input, shape index: {}]   ;;  %s2563_s5 = inlined_call_operand.vmem [shape: f32[1,32], index: 5, kind: input, shape index: {}]   ;;  %s2564_s6 = inlined_call_operand.vmem [shape: f32[32,32], index: 6, kind: input, shape index: {}]   ;;  %s2565_s7 = inlined_call_operand.vmem [shape: f32[1,32], index: 7, kind: input, shape index: {}]   ;;  %s2566_s8 = inlined_call_operand.vmem [shape: f32[32,32], index: 8, kind: input, shape index: {}]   ;;  %s2567_s9 = inlined_call_operand.vmem [shape: f32[1,32], index: 9, kind: input, shape index: {}]   ;;  %s2568_s10 = inlined_call_operand.vmem [shape: f32[64,32], index: 10, kind: input, shape index: {}]   ;;  %s2569_s11 = inlined_call_operand.vmem [shape: f32[1,32], index: 11, kind: input, shape index: {}]   ;;  %s2570_s12 = inlined_call_operand.vmem [shape: f32[32,16], index: 12, kind: input, shape index: {}]   ;;  %s2571_s13 = inlined_call_operand.vmem [shape: f32[1,16], index: 13, kind: input, shape index: {}]   ;;  %s2572_s14 = inlined_call_operand.vmem [shape: f32[16,2], index: 14, kind: input, shape index: {}]   ;;  %s2573_s15 = inlined_call_operand.vmem [shape: f32[1,2], index: 15, kind: input, shape index: {}]   ;;  %s2574_s16 = inlined_call_operand.hbm [shape: f32[2,1,2], index: 16, kind: output, shape index: {}]  }
   0x1   :  { %2578 = sst [smem:[#allocation8_spill]] %s2558_s0 }
   0x2   :  { %2579 = sst [smem:[#allocation9_spill]] %s2559_s1 }
   0x3   :  { %2580 = sst [smem:[#allocation10_spill]] %s2560_s2 }
   0x4   :  { %21 = vsyncpa [#allocation3], 0 }
   0x5   :  { %23 = vsyncpa [#allocation3 + $0x1], 0  ;;  %s2165_s21 = smov 0   ;;  %s2167_s22 = smov 0  }
   0x6   :  { %s2169_s23 = smov 0   ;;  %s2171_s24 = smov 0  }
   0x7 LB: > { %2581 = sst [smem:[#allocation5_spill]] %s2070_s23  ;;  %s2186_s25 = sadd.s32 4294967295, %s2074_s24   ;;  %s2074_s24 = sphi %s2171_s24, %s2591_s24   ;;  %s2070_s23 = sphi %s2169_s23, %s2593_s23   ;;  %s2066_s22 = sphi %s2167_s22, %s2595_s22   ;;  %s2062_s21 = sphi %s2165_s21, %s2594_s21  }
   0x8   : > { %s1748_s26 = sadd.s32 4294967294, %s2074_s24   ;;  %s2190_s27 = sadd.s32 1, %s2074_s24  }
   0x9   : > { %2582 = sst [smem:[#allocation6_spill]] %s2190_s27  ;;  %s382_s28 = sadd.s32 1, %s2070_s23 }
   0xa   : > { %s379_s29 = ssub.s32 %s2074_s24, %s2190_s27  ;;  %p392_p0 = scmp.ne.s32.totalorder %s2070_s23, %s2066_s22 }
   0xb   : > { %p380_p1 = scmp.eq.s32.totalorder %s379_s29, 0  ;;  %p393_p2 = scmp.eq.s32.totalorder %s2186_s25, 1 }
   0xc   : > { %p398_p3 = scmp.ne.s32.totalorder %s2066_s22, %s2062_s21  ;;  %p399_p4 = scmp.eq.s32.totalorder %s1748_s26, 1 }
   0xd   : > { %s2201_s30 = scalar_select %p380_p1, %s2070_s23, %s382_s28  }
   0xe   : > { %p2203_p5 = por %p393_p2, %p392_p0  ;;  %p2207_p6 = por %p399_p4, %p398_p3 }
   0xf   : > { %2583 = sst [smem:[#allocation7_spill]] %s2201_s30  ;;  %p1751_p7 = scmp.ge.s32.totalorder %s2074_s24, 1 }
  0x10   : > { %p473_p8 = scmp.lt.s32.totalorder %s2074_s24, 3 }
  0x12   : > { %p474_p9 = pnand %p1751_p7, %p473_p8 }
  0x13   : > { %s2586_s2 = sld [smem:[#allocation10_spill]] (!%p474_p9)  ;;  %p525_p10 = scmp.lt.s32.totalorder (!%p474_p9), %s2186_s25, 1  ;;  %v2076_v3 = vmov (!%p474_p9), 0.0   ;;  %vm2077_vm0 = vmmov (!%p474_p9), 0   ;;  %vm553_vm1 = vcmask (!%p474_p9), 392192   ;;  %v598_v12 = vld [vmem:[%s2562_s4] sm:$0xff] (!%p474_p9)  ;;  %v603_v18 = vlaneseq (!%p474_p9) }
  0x14   : > { %477 = sbr.rel (%p474_p9) target bundleno = 4524 (0x11ac), region = 84  ;;  %1826 = vmatprep.subr.bf16.mxu0 (!%p474_p9), %v2076_v3  ;;  %1832 = vmatprep.mubr.msk.bf16.mxu0 (!%p474_p9), %vm2077_vm0, %v2076_v3  ;;  %s2587_s1 = sld [smem:[#allocation9_spill]] (!%p474_p9)  ;;  %v599_v13 = vld [vmem:[%s2562_s4 + $0x8] sm:$0xff] (!%p474_p9)  ;;  %v600_v15 = vld [vmem:[%s2562_s4 + $0x10] sm:$0xff] (!%p474_p9)  ;;  %v601_v16 = vld [vmem:[%s2562_s4 + $0x18] sm:$0xff] (!%p474_p9)  ;;  %vm610_vm3 = vcmask (!%p474_p9), 64512  }
  0x15   : > { %1836 = vmatprep.subr.bf16.mxu1 (!%p474_p9), %v2076_v3  ;;  %1840 = vmatprep.mubr.msk.bf16.mxu1 (!%p474_p9), %vm2077_vm0, %v2076_v3  ;;  %v616_v14 = vpack.c.bf16 (!%p474_p9), %v599_v13, %v598_v12  ;;  %v617_v17 = vpack.c.bf16 (!%p474_p9), %v601_v16, %v600_v15  ;;  %s2588_s20 = sld [smem:[#allocation8_spill]] (!%p474_p9)  ;;  %v2267_v19 = vshrl.u32 (!%p474_p9), %v603_v18, 7  ;;  %v2269_v20 = vand.u32 (!%p474_p9), 127, %v603_v18  ;;  %v1754_v26 = vld [vmem:[%s2561_s3] ss:$0 sm:$0xff] (!%p474_p9)  ;;  %s2078_s19 = smov (!%p474_p9), 32  }
  0x16   : > { %vm618_vm4 = vcmask (!%p474_p9), 261120   ;;  %vm668_vm5 = vcmask (!%p474_p9), 1043456   ;;  %v1758_v47 = vld [vmem:[%s2563_s5] ss:$0 sm:$0xff] (!%p474_p9)  ;;  %vm986_vm14 = vcmask (!%p474_p9), 27648   ;;  %vm1044_vm15 = vcmask (!%p474_p9), 1041408  }
  0x17   : > { %1837 = vmatpush3.bf16.msra.mxu1 (!%p474_p9), %v616_v14  ;;  %vm2273_vm2 = vcmp.eq.s32.totalorder (!%p474_p9), %v2267_v19, %v2269_v20  ;;  %vm793_vm7 = vcmp.lt.s32.totalorder (!%p474_p9), %v2269_v20, %v2267_v19  ;;  %v1308_v22 = vld [vmem:[%s2566_s8 + $0x8] sm:$0xff] (!%p474_p9) }
  0x18   : > { %1838 = vmatprep.subr.bf16.mxu1 (!%p474_p9), %v2076_v3  ;;  %v2280_v23 = vsel (!%p474_p9), %vm2273_vm2, 1.0, %v2076_v3 }
  0x19   : > { %v536_v0 = vld [vmem:[%s2586_s2] sm:$0xff] (!%p474_p9)  ;;  %v537_v1 = vld [vmem:[%s2586_s2 + $0x8] sm:$0xff] (!%p474_p9)  ;;  %v538_v2 = vld [vmem:[%s2586_s2 + $0x10] sm:$0xff] (!%p474_p9) }
  0x1a   : > { %v543_v4 = vpack.c.bf16 (!%p474_p9), %v537_v1, %v536_v0  ;;  %v539_v5 = vld [vmem:[%s2586_s2 + $0x18] sm:$0xff] (!%p474_p9)  ;;  %v540_v7 = vld [vmem:[%s2586_s2 + $0x20] sm:$0xff] (!%p474_p9)  ;;  %v541_v8 = vld [vmem:[%s2586_s2 + $0x28] sm:$0xff] (!%p474_p9) }
  0x1b   : > { %s2230_s18 = scalar_select %p525_p10, %s2186_s25, 1  ;;  %v544_v6 = vpack.c.bf16 %v539_v5, %v538_v2  ;;  %v545_v9 = vpack.c.bf16 %v541_v8, %v540_v7  ;;  %1839 = vmatpush3.bf16.msra.mxu1 %v617_v17 }
  0x1c   : > { %1827 = vmatpush3.bf16.msra.mxu0 %v543_v4  ;;  %1844 = vmatprep.subr.bf16.mxu1 %v2076_v3 }
  0x1d   : > { %1828 = vmatprep.subr.bf16.mxu0 %v2076_v3  ;;  %s1752_s26 = sshll.u32 %s2230_s18, 3 }
  0x1e   : > { %s532_s27 = scalar_lea.vmem %s2587_s1, %s1752_s26  ;;  %s528_s23 = scalar_lea.vmem %s2588_s20, %s1752_s26 }
  0x1f   : > { %v535_v10 = vld [vmem:[%s532_s27] sm:$0xff]  ;;  %s1778_s26 = sshll.u32 %s2186_s25, 4  ;;  %s2079_s25 = smov [#allocation2]  }
  0x20   : > { %1829 = vmatpush3.bf16.msra.mxu0 %v544_v6  ;;  %v542_v11 = vpack.c.bf16 %v535_v10, %v535_v10  ;;  %v534_v21 = vld [vmem:[%s528_s23] sm:$0xff]  ;;  %s523_s23 = sand.u32 1, %s2066_s22   ;;  %s2515_s29 = scalar_lea.hbm %s2574_s16, %s1778_s26 }
  0x21   : > { %1830 = vmatprep.subr.bf16.mxu0 %v2076_v3  ;;  %v609_v24 = vadd.f32 %v2280_v23, %v534_v21  ;;  %v721_v34 = vsel %vm610_vm3, %v534_v21, 0.0  ;;  %v729_v61 = vpack.c.bf16 %v534_v21, %v534_v21  ;;  %s1669_s18 = scalar_lea.sflag [#allocation3], %s523_s23  ;;  %s2016_s1 = sshll.u32 %s2079_s25, 4  ;;  %s2017_s1 = int_to_ptr.vmem [resolvable:$false] %s2016_s1 }
  0x22   : > { %s2018_s2 = scalar_lea.vmem %s2017_s1, 32 }
  0x23   : > { %v611_v25 = vsel %vm610_vm3, %v609_v24, 0.0  ;;  %v663_v43 = vpack.c.bf16 %v609_v24, %v609_v24  ;;  %v869_v21 = vsel %vm668_vm5, %v729_v61, 0 }
  0x24   : > { %1831 = vmatpush3.bf16.msra.mxu0 %v545_v9  ;;  %612 = vadd.xlane.f32.xlu0 %v611_v25 }
  0x25   : > { %1850 = vmatprep.subr.bf16.mxu0 %v2076_v3 }
  0x27   : > { %1833 = vmatmul.mubr.msk.bf16.vlgmr.msra.gmra.mrb[0].mxu0 %vm553_vm1, %v542_v11  ;;  %vm1040_vm1 = vcmask 31744  }
  0x28   : > { %1852 = vmatprep.mubr.msk.bf16.mxu0 %vm2077_vm0, %v2076_v3  ;;  %722 = vadd.xlane.f32.xlu0 %v721_v34 }
  0xb1   : > { %v613_v35 = vpop.xlane.xlu0 %612 }
  0xb2   : > { %1994 = vrsqrt.f32 %v613_v35  ;;  %v980_v35 = vld [vmem:[%s2564_s6] sm:$0xff] }
  0xb5   : > { %v723_v45 = vpop.xlane.xlu0 %722 }
  0xb6   : > { %v725_v46 = vmax.f32 %v723_v45, 1.0  ;;  %vm724_vm6 = vcmp.gt.f32.partialorder %v723_v45, 0.0 }
  0xb8   : > { %1996 = vrsqrt.f32 %v725_v46  ;;  %v982_v46 = vld [vmem:[%s2564_s6 + $0x10] sm:$0xff] }
  0xbc   : > { %v1995_v36 = vpop.eup %1994 }
  0xc2   : > { %v1997_v52 = vpop.eup %1996 }
  0xc3   : > { %v727_v56 = vsel %vm724_vm6, %v1997_v52, 0.0 }
  0xfa   : > { %v591_v27 = vpop.f32.mrb[0].mxu0 }
  0xfb   : > { %v592_v28 = vadd.f32 %v1754_v26, %v591_v27  ;;  %v1834_v29 = vpop.f32.mrb[1].mxu0 }
  0xfc   : > { %v594_v30 = vpop.f32.mrb[2].mxu0  ;;  %v810_v29 = vcvt.s32.f32 %v2269_v20 }
  0xfd   : > { %v597_v31 = vmax.f32 %v592_v28, 0.0  ;;  %v1835_v32 = vpop.f32.mrb[3].mxu0 }
  0xfe   : > { %v809_v32 = vcvt.s32.f32 %v2267_v19  ;;  %v1309_v19 = vld [vmem:[%s2566_s8 + $0x10] sm:$0xff] }
  0xff   : > { %v615_v33 = vpack.c.bf16 %v597_v31, %v597_v31 }
 0x101   : > { %1841 = vmatmul.mubr.msk.bf16.vlgmr.msra.gmra.mrb[0].mxu1 %vm618_vm4, %v615_v33 }
 0x102   : > { %1846 = vmatprep.mubr.msk.bf16.mxu1 %vm2077_vm0, %v2076_v3 }
 0x1d4   : > { %v656_v37 = vpop.f32.mrb[0].mxu1 }
 0x1d5   : > { %v662_v38 = vmul.f32 %v1995_v36, %v656_v37  ;;  %v1842_v39 = vpop.f32.mrb[1].mxu1 }
 0x1d6   : > { %v659_v40 = vpop.f32.mrb[2].mxu1 }
 0x1d7   : > { %v664_v41 = vpack.c.bf16 %v662_v38, %v662_v38  ;;  %v1843_v42 = vpop.f32.mrb[3].mxu1 }
 0x1d9   : > { %v670_v44 = vsel %vm668_vm5, %v664_v41, 0 }
 0x1da   : > { %1845 = vmatpush3.bf16.msra.mxu1 %v670_v44 }
 0x1db   : > { %1856 = vmatprep.subr.bf16.mxu1 %v2076_v3 }
 0x1dd   : > { %1847 = vmatmul.mubr.msk.bf16.vlgmr.msra.gmra.mrb[4].mxu1 %vm610_vm3, %v663_v43 }
 0x1de   : > { %1858 = vmatprep.mubr.msk.bf16.mxu1 %vm2077_vm0, %v2076_v3 }
 0x2b0   : > { %v706_v48 = vpop.f32.mrb[4].mxu1 }
 0x2b1   : > { %v712_v49 = vmul.f32 %v1995_v36, %v706_v48  ;;  %v1848_v50 = vpop.f32.mrb[5].mxu1  ;;  %v981_v36 = vld [vmem:[%s2564_s6 + $0x8] sm:$0xff] }
 0x2b2   : > { %v709_v51 = vpop.f32.mrb[6].mxu1  ;;  %v992_v40 = vpack.c.bf16 %v981_v36, %v980_v35 }
 0x2b3   : > { %v719_v53 = vadd.f32 %v1758_v47, %v712_v49  ;;  %v1849_v54 = vpop.f32.mrb[7].mxu1  ;;  %v983_v47 = vld [vmem:[%s2564_s6 + $0x18] sm:$0xff] }
 0x2b4   : > { %v993_v48 = vpack.c.bf16 %v983_v47, %v982_v46 }
 0x2b5   : > { %v720_v55 = vmax.f32 %v719_v53, 0.0 }
 0x2b7   : > { %v818_v57 = vpack.c.bf16 %v720_v55, %v720_v55  ;;  %v728_v58 = vmul.f32 %v727_v56, %v720_v55 }
 0x2b9   : > { %v823_v59 = vsel %vm668_vm5, %v818_v57, 0  ;;  %v730_v60 = vpack.c.bf16 %v728_v58, %v728_v58 }
 0x2ba   : > { %1857 = vmatpush3.bf16.msra.mxu1 %v823_v59 }
 0x2bb   : > { %v735_v62 = vsel %vm668_vm5, %v730_v60, 0  ;;  %1868 = vmatprep.subr.bf16.mxu1 %v2076_v3 }
 0x2bc   : > { %1851 = vmatpush3.bf16.msra.mxu0 %v735_v62 }
 0x2bd   : > { %1862 = vmatprep.subr.bf16.mxu0 %v2076_v3 }
 0x2bf   : > { %1853 = vmatmul.mubr.msk.bf16.vlgmr.msra.gmra.mrb[4].mxu0 %vm610_vm3, %v729_v61 }
 0x2c0   : > { %1864 = vmatprep.mubr.msk.bf16.mxu0 %vm2077_vm0, %v2076_v3  ;;  %1863 = vmatpush3.bf16.msra.mxu0 %v869_v21 }
 0x2c1   : > { %1874 = vmatprep.subr.bf16.mxu0 %v2076_v3 }
 0x392   : > { %v771_v63 = vpop.f32.mrb[4].mxu0 }
 0x393   : > { %v777_v0 = vmul.f32 %v771_v63, %v727_v56  ;;  %v1854_v1 = vpop.f32.mrb[5].mxu0 }
 0x394   : > { %v774_v2 = vpop.f32.mrb[6].mxu0 }
 0x395   : > { %v1855_v4 = vpop.f32.mrb[7].mxu0  ;;  %v778_v5 = vsub.f32 %v720_v55, %v777_v0 }
 0x397   : > { %v779_v6 = vand.u32 2147483647, %v778_v5 }
 0x399   : > { %v780_v7 = vsel %vm618_vm4, %v779_v6, 0.0 }
 0x39a   : > { %781 = vadd.xlane.f32.xlu1 %v780_v7 }
 0x427   : > { %v782_v8 = vpop.xlane.xlu1 %781 }
 0x428   : > { %v783_v9 = vsel %vm2273_vm2, %v782_v8, 0.0 }
 0x429   : > { %v784_v10 = vsel %vm610_vm3, %v783_v9, 0.0 }
 0x42a   : > { %v785_v11 = vrot.slane %v784_v10, 4 }
 0x42c   : > { %v786_v12 = vadd.f32 %v785_v11, %v784_v10 }
 0x42e   : > { %v787_v13 = vrot.slane %v786_v12, 2 }
 0x430   : > { %v788_v14 = vadd.f32 %v787_v13, %v786_v12 }
 0x432   : > { %v789_v15 = vrot.slane %v788_v14, 1 }
 0x434   : > { %v790_v16 = vadd.f32 %v789_v15, %v788_v14  ;;  %v1766_v15 = vld [vmem:[%s2565_s7] ss:$0 sm:$0xff] }
 0x436   : > { %vm792_vm8 = vcmp.eq.f32.partialorder %v790_v16, %v782_v8  ;;  %vm791_vm9 = vcmp.gt.f32.partialorder %v790_v16, %v782_v8  ;;  %1998 = vtanh.f32 %v790_v16 }
 0x437   : > { %vm794_vm10 = vmand %vm792_vm8, %vm793_vm7 }
 0x438   : > { %vm795_vm11 = vmor %vm791_vm9, %vm794_vm10 }
 0x439   : > { %v1760_v17 = vsel %vm795_vm11, 1.0, %v2076_v3  ;;  %vm1286_vm11 = vcmask 254976  }
 0x43a   : > { %v798_v18 = vsel %vm610_vm3, %v1760_v17, 0.0 }
 0x43b   : > { %799 = vadd.xlane.f32.xlu1 %v798_v18 }
 0x440   : > { %v1999_v38 = vpop.eup %1998 }
 0x4c8   : > { %v800_v24 = vpop.xlane.xlu1 %799 }
 0x4c9   : > { %v801_v25 = vsel %vm2273_vm2, %v800_v24, 0.0  ;;  %vm813_vm12 = vcmp.eq.f32.partialorder %v800_v24, %v810_v29 }
 0x4ca   : > { %v802_v26 = vsel %vm610_vm3, %v801_v25, 0.0  ;;  %v814_v37 = vsel %vm813_vm12, 1.0, %v2076_v3  ;;  %vm1358_vm12 = vcmask 9216  }
 0x4cb   : > { %v803_v27 = vrot.slane %v802_v26, 4  ;;  %v912_v43 = vpack.c.bf16 %v814_v37, %v814_v37 }
 0x4cd   : > { %v804_v28 = vadd.f32 %v803_v27, %v802_v26  ;;  %v917_v45 = vsel %vm668_vm5, %v912_v43, 0  ;;  %vm959_vm5 = vcmask 257024  }
 0x4cf   : > { %v805_v30 = vrot.slane %v804_v28, 2 }
 0x4d1   : > { %v806_v31 = vadd.f32 %v805_v30, %v804_v28 }
 0x4d3   : > { %v807_v33 = vrot.slane %v806_v31, 1 }
 0x4d5   : > { %v808_v34 = vadd.f32 %v807_v33, %v806_v31 }
 0x4d7   : > { %vm811_vm13 = vcmp.eq.f32.partialorder %v809_v32, %v808_v34 }
 0x4d8   : > { %v812_v39 = vsel %vm811_vm13, 1.0, %v2076_v3  ;;  %vm1416_vm13 = vcmask 1040384  }
 0x4d9   : > { %v816_v41 = vmul.f32 %v1999_v38, %v812_v39  ;;  %v865_v42 = vpack.c.bf16 %v812_v39, %v812_v39 }
 0x4db   : > { %1865 = vmatmul.mubr.msk.bf16.vlgmr.msra.gmra.mrb[8].mxu0 %vm610_vm3, %v865_v42  ;;  %v817_v44 = vpack.c.bf16 %v816_v41, %v816_v41 }
 0x4dc   : > { %1875 = vmatpush3.bf16.msra.mxu0 %v992_v40  ;;  %1878 = vmatprep.mubr.msk.bf16.mxu0 %vm2077_vm0, %v2076_v3 }
 0x4dd   : > { %1859 = vmatmul.mubr.msk.bf16.vlgmr.msra.gmra.mrb[8].mxu1 %vm610_vm3, %v817_v44  ;;  %1876 = vmatprep.subr.bf16.mxu0 %v2076_v3 }
 0x4de   : > { %1869 = vmatpush3.bf16.msra.mxu1 %v917_v45  ;;  %1870 = vmatprep.mubr.msk.bf16.mxu1 %vm2077_vm0, %v2076_v3 }
 0x4df   : > { %1882 = vmatprep.subr.bf16.mxu1 %v2076_v3 }
 0x4e0   : > { %1877 = vmatpush3.bf16.msra.mxu0 %v993_v48 }
 0x4e1   : > { %1888 = vmatprep.subr.bf16.mxu0 %v2076_v3 }
 0x5ae   : > { %v905_v49 = vpop.f32.mrb[8].mxu0 }
 0x5af   : > { %v911_v50 = vpack.c.bf16 %v905_v49, %v905_v49  ;;  %v1866_v51 = vpop.f32.mrb[9].mxu0 }
 0x5b0   : > { %v2352_v52 = vpop.f32.mrb[8].mxu1  ;;  %v908_v53 = vpop.f32.mrb[10].mxu0 }
 0x5b1   : > { %v991_v54 = vpack.c.bf16 %v2352_v52, %v2352_v52  ;;  %v1860_v55 = vpop.f32.mrb[9].mxu1  ;;  %v1867_v56 = vpop.f32.mrb[11].mxu0  ;;  %1871 = vmatmul.mubr.msk.bf16.vlgmr.msra.gmra.mrb[12].mxu1 %vm610_vm3, %v911_v50  ;;  %v967_v53 = vsel %vm959_vm5, %v2352_v52, 0.0 }
 0x5b2   : > { %v862_v57 = vpop.f32.mrb[10].mxu1  ;;  %1884 = vmatprep.mubr.msk.bf16.mxu1 %vm2077_vm0, %v2076_v3  ;;  %v968_v55 = vrot.slane %v967_v53, 4 }
 0x5b3   : > { %v1861_v58 = vpop.f32.mrb[11].mxu1  ;;  %1879 = vmatmul.mubr.msk.bf16.vlgmr.msra.gmra.mrb[12].mxu0 %vm618_vm4, %v991_v54 }
 0x5b4   : > { %1890 = vmatprep.mubr.msk.bf16.mxu0 %vm2077_vm0, %v2076_v3  ;;  %v969_v58 = vadd.f32 %v968_v55, %v967_v53 }
 0x684   : > { %v953_v59 = vpop.f32.mrb[12].mxu1 }
 0x685   : > { %v1872_v60 = vpop.f32.mrb[13].mxu1  ;;  %v1097_v61 = vsel %vm986_vm14, %v953_v59, 0.0  ;;  %v985_v62 = vadd.f32 %v953_v59, %v2280_v23  ;;  %v1105_v35 = vpack.c.bf16 %v953_v59, %v953_v59 }
 0x686   : > { %1098 = vadd.xlane.f32.xlu1 %v1097_v61  ;;  %v956_v63 = vpop.f32.mrb[14].mxu1  ;;  %v1031_v0 = vpop.f32.mrb[12].mxu0  ;;  %v970_v60 = vrot.slane %v969_v58, 2 }
 0x687   : > { %v1873_v1 = vpop.f32.mrb[15].mxu1  ;;  %v1880_v2 = vpop.f32.mrb[13].mxu0  ;;  %v987_v4 = vsel %vm986_vm14, %v985_v62, 0.0  ;;  %v1038_v12 = vpack.c.bf16 %v985_v62, %v985_v62  ;;  %v1242_v37 = vsel %vm1044_vm15, %v1105_v35, 0 }
 0x688   : > { %988 = vadd.xlane.f32.xlu0 %v987_v4  ;;  %v1034_v5 = vpop.f32.mrb[14].mxu0  ;;  %v971_v62 = vadd.f32 %v970_v60, %v969_v58 }
 0x689   : > { %v1881_v6 = vpop.f32.mrb[15].mxu0 }
 0x68a   : > { %v972_v63 = vrot.slane %v971_v62, 1 }
 0x713   : > { %v1099_v13 = vpop.xlane.xlu1 %1098 }
 0x714   : > { %v1101_v14 = vmax.f32 %v1099_v13, 1.0  ;;  %vm1100_vm3 = vcmp.gt.f32.partialorder %v1099_v13, 0.0 }
 0x715   : > { %v989_v7 = vpop.xlane.xlu0 %988 }
 0x716   : > { %2000 = vrsqrt.f32 %v989_v7 }
 0x717   : > { %2002 = vrsqrt.f32 %v1101_v14 }
 0x720   : > { %v2001_v8 = vpop.eup %2000 }
 0x721   : > { %v1037_v9 = vmul.f32 %v2001_v8, %v1031_v0  ;;  %v2003_v24 = vpop.eup %2002  ;;  %v973_v0 = vadd.f32 %v972_v63, %v971_v62 }
 0x722   : > { %v1103_v28 = vsel %vm1100_vm3, %v2003_v24, 0.0 }
 0x723   : > { %v1039_v10 = vpack.c.bf16 %v1037_v9, %v1037_v9  ;;  %v974_v1 = vmul.f32 0.25, %v973_v0 }
 0x725   : > { %v1046_v11 = vsel %vm1044_vm15, %v1039_v10, 0 }
 0x726   : > { %1883 = vmatpush3.bf16.msra.mxu1 %v1046_v11 }
 0x727   : > { %1894 = vmatprep.subr.bf16.mxu1 %v2076_v3 }
 0x729   : > { %1885 = vmatmul.mubr.msk.bf16.vlgmr.msra.gmra.mrb[16].mxu1 %vm1040_vm1, %v1038_v12  ;;  %v1307_v12 = vld [vmem:[%s2566_s8] sm:$0xff] }
 0x72a   : > { %1896 = vmatprep.mubr.msk.bf16.mxu1 %vm2077_vm0, %v2076_v3 }
 0x7fc   : > { %v1082_v16 = vpop.f32.mrb[16].mxu1 }
 0x7fd   : > { %v1088_v17 = vmul.f32 %v2001_v8, %v1082_v16  ;;  %v1886_v18 = vpop.f32.mrb[17].mxu1  ;;  %v1364_v16 = vpack.c.bf16 %v1308_v22, %v1307_v12 }
 0x7fe   : > { %v1085_v21 = vpop.f32.mrb[18].mxu1 }
 0x7ff   : > { %v1095_v25 = vadd.f32 %v1766_v15, %v1088_v17  ;;  %v1887_v26 = vpop.f32.mrb[19].mxu1 }
 0x801   : > { %v1096_v27 = vmax.f32 %v1095_v25, 0.0 }
 0x803   : > { %v1191_v30 = vpack.c.bf16 %v1096_v27, %v1096_v27  ;;  %v1104_v31 = vmul.f32 %v1103_v28, %v1096_v27 }
 0x805   : > { %v1196_v33 = vsel %vm1044_vm15, %v1191_v30, 0  ;;  %v1106_v34 = vpack.c.bf16 %v1104_v31, %v1104_v31 }
 0x806   : > { %1895 = vmatpush3.bf16.msra.mxu1 %v1196_v33 }
 0x807   : > { %v1111_v36 = vsel %vm1044_vm15, %v1106_v34, 0  ;;  %1906 = vmatprep.subr.bf16.mxu1 %v2076_v3 }
 0x808   : > { %1889 = vmatpush3.bf16.msra.mxu0 %v1111_v36 }
 0x809   : > { %1900 = vmatprep.subr.bf16.mxu0 %v2076_v3 }
 0x80b   : > { %1891 = vmatmul.mubr.msk.bf16.vlgmr.msra.gmra.mrb[16].mxu0 %vm1040_vm1, %v1105_v35 }
 0x80c   : > { %1901 = vmatpush3.bf16.msra.mxu0 %v1242_v37  ;;  %1902 = vmatprep.mubr.msk.bf16.mxu0 %vm2077_vm0, %v2076_v3 }
 0x80d   : > { %1912 = vmatprep.subr.bf16.mxu0 %v2076_v3 }
 0x8de   : > { %v1147_v38 = vpop.f32.mrb[16].mxu0 }
 0x8df   : > { %v1153_v39 = vmul.f32 %v1147_v38, %v1103_v28  ;;  %v1892_v40 = vpop.f32.mrb[17].mxu0 }
 0x8e0   : > { %v1150_v41 = vpop.f32.mrb[18].mxu0 }
 0x8e1   : > { %v1154_v42 = vsub.f32 %v1096_v27, %v1153_v39  ;;  %v1893_v43 = vpop.f32.mrb[19].mxu0 }
 0x8e3   : > { %v1155_v44 = vand.u32 2147483647, %v1154_v42 }
 0x8e5   : > { %v1156_v45 = vsel %vm959_vm5, %v1155_v44, 0.0 }
 0x8e6   : > { %1157 = vadd.xlane.f32.xlu0 %v1156_v45 }
 0x973   : > { %v1158_v46 = vpop.xlane.xlu0 %1157 }
 0x974   : > { %v1159_v47 = vsel %vm2273_vm2, %v1158_v46, 0.0 }
 0x975   : > { %v1160_v48 = vsel %vm986_vm14, %v1159_v47, 0.0 }
 0x976   : > { %v1161_v49 = vrot.slane %v1160_v48, 4 }
 0x978   : > { %v1162_v50 = vadd.f32 %v1161_v49, %v1160_v48 }
 0x97a   : > { %v1163_v51 = vrot.slane %v1162_v50, 2 }
 0x97c   : > { %v1164_v54 = vadd.f32 %v1163_v51, %v1162_v50 }
 0x97e   : > { %v1165_v56 = vrot.slane %v1164_v54, 1 }
 0x980   : > { %v1166_v57 = vadd.f32 %v1165_v56, %v1164_v54 }
 0x982   : > { %vm1168_vm6 = vcmp.eq.f32.partialorder %v1166_v57, %v1158_v46  ;;  %vm1167_vm8 = vcmp.gt.f32.partialorder %v1166_v57, %v1158_v46  ;;  %2004 = vtanh.f32 %v1166_v57 }
 0x983   : > { %vm1169_vm9 = vmand %vm1168_vm6, %vm793_vm7 }
 0x984   : > { %vm1170_vm10 = vmor %vm1167_vm8, %vm1169_vm9 }
 0x985   : > { %v1768_v59 = vsel %vm1170_vm10, 1.0, %v2076_v3 }
 0x986   : > { %v1173_v61 = vsel %vm986_vm14, %v1768_v59, 0.0 }
 0x987   : > { %1174 = vadd.xlane.f32.xlu1 %v1173_v61 }
 0x98c   : > { %v2005_v14 = vpop.eup %2004 }
 0x998   : > { %976 = vrot.lane.b32.xlu1 %v974_v1, %s2078_s19 }
 0xa14   : > { %v1175_v2 = vpop.xlane.xlu1 %1174 }
 0xa15   : > { %v1176_v4 = vsel %vm2273_vm2, %v1175_v2, 0.0  ;;  %vm1186_vm7 = vcmp.eq.f32.partialorder %v1175_v2, %v810_v29 }
 0xa16   : > { %v1177_v5 = vsel %vm986_vm14, %v1176_v4, 0.0  ;;  %v1187_v13 = vsel %vm1186_vm7, 1.0, %v2076_v3  ;;  %vm1412_vm14 = vcmask 15360  }
 0xa17   : > { %v1178_v6 = vrot.slane %v1177_v5, 4  ;;  %v1285_v17 = vpack.c.bf16 %v1187_v13, %v1187_v13 }
 0xa18   : > { %v977_v4 = vpop.permute.xlu1 %976 }
 0xa19   : > { %v1179_v7 = vadd.f32 %v1178_v6, %v1177_v5  ;;  %v1316_v21 = vsel %vm1044_vm15, %v1285_v17, 0  ;;  %v1496_v17 = vld [vmem:[%s2568_s10 + $0x10] sm:$0xff]  ;;  %vm1508_vm15 = vcmask 523264  }
 0xa1b   : > { %v1180_v8 = vrot.slane %v1179_v7, 2 }
 0xa1d   : > { %v1181_v9 = vadd.f32 %v1180_v8, %v1179_v7 }
 0xa1f   : > { %v1182_v10 = vrot.slane %v1181_v9, 1 }
 0xa21   : > { %v1183_v11 = vadd.f32 %v1182_v10, %v1181_v9 }
 0xa23   : > { %vm1184_vm2 = vcmp.eq.f32.partialorder %v809_v32, %v1183_v11  ;;  %v1310_v32 = vld [vmem:[%s2566_s8 + $0x18] sm:$0xff] }
 0xa24   : > { %v1185_v15 = vsel %vm1184_vm2, 1.0, %v2076_v3  ;;  %v1365_v24 = vpack.c.bf16 %v1310_v32, %v1309_v19  ;;  %v1774_v32 = vld [vmem:[%s2567_s9] ss:$0 sm:$0xff] }
 0xa25   : > { %v1189_v20 = vmul.f32 %v2005_v14, %v1185_v15  ;;  %v1238_v29 = vpack.c.bf16 %v1185_v15, %v1185_v15 }
 0xa27   : > { %1903 = vmatmul.mubr.msk.bf16.vlgmr.msra.gmra.mrb[20].mxu0 %vm1040_vm1, %v1238_v29  ;;  %v1190_v18 = vpack.c.bf16 %v1189_v20, %v1189_v20  ;;  %v1494_v20 = vld [vmem:[%s2568_s10] sm:$0xff]  ;;  %v1495_v29 = vld [vmem:[%s2568_s10 + $0x8] sm:$0xff] }
 0xa28   : > { %1913 = vmatpush3.bf16.msra.mxu0 %v1364_v16  ;;  %1916 = vmatprep.mubr.msk.bf16.mxu0 %vm2077_vm0, %v2076_v3 }
 0xa29   : > { %1897 = vmatmul.mubr.msk.bf16.vlgmr.msra.gmra.mrb[20].mxu1 %vm1040_vm1, %v1190_v18  ;;  %1914 = vmatprep.subr.bf16.mxu0 %v2076_v3  ;;  %v1503_v18 = vpack.c.bf16 %v1495_v29, %v1494_v20  ;;  %v1609_v29 = vld [vmem:[%s2573_s15] sm:$0x1] }
 0xa2a   : > { %1907 = vmatpush3.bf16.msra.mxu1 %v1316_v21  ;;  %1908 = vmatprep.mubr.msk.bf16.mxu1 %vm2077_vm0, %v2076_v3  ;;  %v1497_v21 = vld [vmem:[%s2568_s10 + $0x18] sm:$0xff] }
 0xa2b   : > { %1920 = vmatprep.subr.bf16.mxu1 %v2076_v3  ;;  %v1504_v19 = vpack.c.bf16 %v1497_v21, %v1496_v17 }
 0xa2c   : > { %1915 = vmatpush3.bf16.msra.mxu0 %v1365_v24 }
 0xa2d   : > { %1926 = vmatprep.subr.bf16.mxu0 %v2076_v3 }
 0xafa   : > { %v1278_v25 = vpop.f32.mrb[20].mxu0 }
 0xafb   : > { %v1284_v26 = vpack.c.bf16 %v1278_v25, %v1278_v25  ;;  %v1904_v27 = vpop.f32.mrb[21].mxu0 }
 0xafc   : > { %v1232_v28 = vpop.f32.mrb[20].mxu1  ;;  %v1281_v30 = vpop.f32.mrb[22].mxu0 }
 0xafd   : > { %v1363_v31 = vpack.c.bf16 %v1232_v28, %v1232_v28  ;;  %v1898_v33 = vpop.f32.mrb[21].mxu1  ;;  %v1905_v34 = vpop.f32.mrb[23].mxu0  ;;  %1909 = vmatmul.mubr.msk.bf16.vlgmr.msra.gmra.mrb[24].mxu1 %vm1040_vm1, %v1284_v26  ;;  %v1294_v37 = vsel %vm1286_vm11, %v1232_v28, 0.0  ;;  %v1287_v56 = vsel %vm1286_vm11, %v1232_v28, -inf }
 0xafe   : > { %v1235_v35 = vpop.f32.mrb[22].mxu1  ;;  %1922 = vmatprep.mubr.msk.bf16.mxu1 %vm2077_vm0, %v2076_v3  ;;  %v1295_v38 = vrot.slane %v1294_v37, 4  ;;  %v1288_v58 = vrot.slane %v1287_v56, 4  ;;  %v1498_v34 = vld [vmem:[%s2568_s10 + $0x20] sm:$0xff] }
 0xaff   : > { %v1899_v36 = vpop.f32.mrb[23].mxu1  ;;  %1917 = vmatmul.mubr.msk.bf16.vlgmr.msra.gmra.mrb[24].mxu0 %vm618_vm4, %v1363_v31  ;;  %v1499_v35 = vld [vmem:[%s2568_s10 + $0x28] sm:$0xff] }
 0xb00   : > { %1934 = vmatprep.mubr.msk.bf16.mxu0 %vm2077_vm0, %v2076_v3  ;;  %v1296_v47 = vadd.f32 %v1295_v38, %v1294_v37  ;;  %v1289_v60 = vmax.f32 %v1287_v56, %v1288_v58  ;;  %1927 = vmatpush3.bf16.msra.mxu0 %v1503_v18  ;;  %v1505_v37 = vpack.c.bf16 %v1499_v35, %v1498_v34 }
 0xb01   : > { %1928 = vmatprep.subr.bf16.mxu0 %v2076_v3 }
 0xb02   : > { %v1297_v50 = vrot.slane %v1296_v47, 2  ;;  %v1290_v62 = vrot.slane %v1289_v60, 2 }
 0xb04   : > { %v1298_v51 = vadd.f32 %v1297_v50, %v1296_v47  ;;  %v1291_v0 = vmax.f32 %v1289_v60, %v1290_v62  ;;  %1929 = vmatpush3.bf16.msra.mxu0 %v1504_v19  ;;  %v1554_v60 = vld [vmem:[%s2570_s12 + $0x8] sm:$0xff]  ;;  %v1555_v62 = vld [vmem:[%s2570_s12 + $0x10] sm:$0xff] }
 0xb05   : > { %1930 = vmatprep.subr.bf16.mxu0 %v2076_v3 }
 0xb06   : > { %v1299_v53 = vrot.slane %v1298_v51, 1  ;;  %v1292_v2 = vrot.slane %v1291_v0, 1 }
 0xb08   : > { %v1300_v54 = vadd.f32 %v1299_v53, %v1298_v51  ;;  %v1293_v8 = vmax.f32 %v1291_v0, %v1292_v2  ;;  %1931 = vmatpush3.bf16.msra.mxu0 %v1505_v37 }
 0xb09   : > { %1932 = vmatprep.subr.bf16.mxu0 %v2076_v3 }
 0xb0a   : > { %v1301_v55 = vmul.f32 0.5, %v1300_v54 }
 0xbd0   : > { %v1352_v39 = vpop.f32.mrb[24].mxu1 }
 0xbd1   : > { %v1353_v40 = vadd.f32 %v1352_v39, %v2280_v23  ;;  %v1910_v41 = vpop.f32.mrb[25].mxu1  ;;  %v960_v23 = vsel %vm959_vm5, %v2352_v52, -inf  ;;  %v1500_v39 = vld [vmem:[%s2568_s10 + $0x30] sm:$0xff] }
 0xbd2   : > { %v1355_v42 = vpop.f32.mrb[26].mxu1  ;;  %v1403_v43 = vpop.f32.mrb[24].mxu0  ;;  %v961_v57 = vrot.slane %v960_v23, 4 }
 0xbd3   : > { %v1911_v44 = vpop.f32.mrb[27].mxu1  ;;  %v1918_v45 = vpop.f32.mrb[25].mxu0  ;;  %v1359_v46 = vsel %vm1358_vm12, %v1353_v40, 0.0  ;;  %v1410_v16 = vpack.c.bf16 %v1353_v40, %v1353_v40  ;;  %v1501_v40 = vld [vmem:[%s2568_s10 + $0x38] sm:$0xff] }
 0xbd4   : > { %1360 = vadd.xlane.f32.xlu0 %v1359_v46  ;;  %v1406_v48 = vpop.f32.mrb[26].mxu0  ;;  %v962_v59 = vmax.f32 %v960_v23, %v961_v57  ;;  %v1506_v42 = vpack.c.bf16 %v1501_v40, %v1500_v39 }
 0xbd5   : > { %v1919_v49 = vpop.f32.mrb[27].mxu0 }
 0xbd6   : > { %v963_v61 = vrot.slane %v962_v59, 2  ;;  %1933 = vmatpush3.bf16.msra.mxu0 %v1506_v42 }
 0xbd8   : > { %v964_v63 = vmax.f32 %v962_v59, %v963_v61  ;;  %v1553_v59 = vld [vmem:[%s2570_s12] sm:$0xff] }
 0xbd9   : > { %v1558_v61 = vpack.c.bf16 %v1554_v60, %v1553_v59 }
 0xbda   : > { %v965_v1 = vrot.slane %v964_v63, 1 }
 0xbdc   : > { %v966_v6 = vmax.f32 %v964_v63, %v965_v1  ;;  %v1556_v63 = vld [vmem:[%s2570_s12 + $0x18] sm:$0xff]  ;;  %v1507_v1 = vld [vmem:[%s2569_s11] sm:$0x1] }
 0xbdd   : > { %v1559_v0 = vpack.c.bf16 %v1556_v63, %v1555_v62 }
 0xbde   : > { %v979_v7 = vsel %vm618_vm4, %v966_v6, %v977_v4 }
 0xbdf   : > { %v1489_v10 = vmax.f32 %v979_v7, 0.0 }
 0xbea   : > { %1303 = vrot.lane.b32.xlu0 %v1301_v55, %s2078_s19 }
 0xc61   : > { %v1361_v5 = vpop.xlane.xlu0 %1360 }
 0xc62   : > { %2006 = vrsqrt.f32 %v1361_v5 }
 0xc65   : > { %v1304_v52 = vpop.permute.xlu0 %1303 }
 0xc66   : > { %v1306_v9 = vsel %vm618_vm4, %v1293_v8, %v1304_v52 }
 0xc67   : > { %v1490_v11 = vmax.f32 %v1306_v9, 0.0  ;;  %v1605_v9 = vld [vmem:[%s2572_s14] sm:$0xff] }
 0xc69   : > { %v1491_v12 = vadd.f32 %v1490_v11, %v1489_v10  ;;  %v1606_v10 = vld [vmem:[%s2572_s14 + $0x8] sm:$0xff] }
 0xc6a   : > { %v1608_v11 = vpack.c.bf16 %v1606_v10, %v1605_v9 }
 0xc6c   : > { %v2007_v22 = vpop.eup %2006 }
 0xc6d   : > { %v1409_v13 = vmul.f32 %v2007_v22, %v1403_v43 }
 0xc6f   : > { %v1411_v14 = vpack.c.bf16 %v1409_v13, %v1409_v13 }
 0xc71   : > { %v1418_v15 = vsel %vm1416_vm13, %v1411_v14, 0 }
 0xc72   : > { %1921 = vmatpush3.bf16.msra.mxu1 %v1418_v15 }
 0xc73   : > { %1938 = vmatprep.subr.bf16.mxu1 %v2076_v3 }
 0xc75   : > { %1923 = vmatmul.mubr.msk.bf16.vlgmr.msra.gmra.mrb[28].mxu1 %vm1412_vm14, %v1410_v16 }
 0xc76   : > { %1942 = vmatprep.mubr.msk.bf16.mxu1 %vm2077_vm0, %v2076_v3  ;;  %1939 = vmatpush3.bf16.msra.mxu1 %v1558_v61 }
 0xc77   : > { %1940 = vmatprep.subr.bf16.mxu1 %v2076_v3 }
 0xc7a   : > { %1941 = vmatpush3.bf16.msra.mxu1 %v1559_v0 }
 0xc7b   : > { %1946 = vmatprep.subr.bf16.mxu1 %v2076_v3 }
 0xd48   : > { %v1454_v24 = vpop.f32.mrb[28].mxu1 }
 0xd49   : > { %v1460_v25 = vmul.f32 %v2007_v22, %v1454_v24  ;;  %v1924_v26 = vpop.f32.mrb[29].mxu1 }
 0xd4a   : > { %v1457_v27 = vpop.f32.mrb[30].mxu1 }
 0xd4b   : > { %v1467_v28 = vadd.f32 %v1774_v32, %v1460_v25  ;;  %v1925_v30 = vpop.f32.mrb[31].mxu1 }
 0xd4d   : > { %v1468_v31 = vmax.f32 %v1467_v28, 0.0 }
 0xd4f   : > { %v1476_v33 = vsel %vm1286_vm11, %v1468_v31, 0.0  ;;  %v1469_v47 = vsel %vm1286_vm11, %v1468_v31, -inf }
 0xd50   : > { %v1477_v36 = vrot.slane %v1476_v33, 4  ;;  %v1470_v48 = vrot.slane %v1469_v47, 4 }
 0xd52   : > { %v1478_v38 = vadd.f32 %v1477_v36, %v1476_v33  ;;  %v1471_v49 = vmax.f32 %v1469_v47, %v1470_v48 }
 0xd54   : > { %v1479_v41 = vrot.slane %v1478_v38, 2  ;;  %v1472_v50 = vrot.slane %v1471_v49, 2 }
 0xd56   : > { %v1480_v43 = vadd.f32 %v1479_v41, %v1478_v38  ;;  %v1473_v51 = vmax.f32 %v1471_v49, %v1472_v50 }
 0xd58   : > { %v1481_v44 = vrot.slane %v1480_v43, 1  ;;  %v1474_v53 = vrot.slane %v1473_v51, 1 }
 0xd5a   : > { %v1482_v45 = vadd.f32 %v1481_v44, %v1480_v43  ;;  %v1475_v54 = vmax.f32 %v1473_v51, %v1474_v53 }
 0xd5c   : > { %v1483_v46 = vmul.f32 0.5, %v1482_v45 }
 0xd5e   : > { %1485 = vrot.lane.b32.xlu1 %v1483_v46, %s2078_s19  ;;  %s524_s19 = scalar_lea.vmem [#allocation2], %s523_s23 }
 0xd5f   : > { %s1681_s27 = sshll.u32 %s524_s19, 4  ;;  %s2517_s27 = int_to_ptr.vmem [resolvable:$true] %s1681_s27 }
 0xd60   : > { %s2012_s20 = scalar_lea.vmem %s2517_s27, 16  ;;  %p2019_p0 = scmp.lt.s32.totalorder %s2517_s27, %s2017_s1 }
 0xd61   : > { %p2013_p11 = scmp.ne.s32.totalorder %s2517_s27, %s2012_s20  ;;  %p2020_p1 = scmp.lt.s32.totalorder %s2018_s2, %s2012_s20 }
 0xd63   : > { %p2014_p12 = pnand %p2013_p11, %p2203_p5  ;;  %p2021_p2 = por %p2020_p1, %p2019_p0 }
 0xd65   : > { %p2015_p13 = pneg %p2014_p12 }
 0xd67   : > { %p2022_p3 = pnand %p2021_p2, %p2015_p13 }
 0xdd0   : > { %v1486_v55 = vpop.permute.xlu1 %1485 }
 0xdd1   : > { %v1488_v23 = vsel %vm618_vm4, %v1475_v54, %v1486_v55 }
 0xdd2   : > { %v1492_v56 = vmax.f32 %v1488_v23, 0.0 }
 0xdd4   : > { %v1493_v57 = vadd.f32 %v1492_v56, %v1491_v12  ;;  %v1560_v12 = vld [vmem:[%s2571_s13] sm:$0x1] }
 0xdd6   : > { %v1502_v58 = vpack.c.bf16 %v1493_v57, %v1493_v57 }
 0xdd8   : > { %1935 = vmatmul.mubr.msk.bf16.vlgmr.msra.gmra.mrb[28].mxu0 %vm1508_vm15, %v1502_v58 }
 0xeab   : > { %v1546_v2 = vpop.f32.mrb[28].mxu0 }
 0xeac   : > { %v1547_v4 = vadd.f32 %v1546_v2, %v1507_v1  ;;  %v1936_v5 = vpop.f32.mrb[29].mxu0 }
 0xead   : > { %v1549_v6 = vpop.f32.mrb[30].mxu0 }
 0xeae   : > { %v1552_v7 = vmax.f32 %v1547_v4, 0.0  ;;  %v1937_v8 = vpop.f32.mrb[31].mxu0 }
 0xeb0   : > { %v1557_v52 = vpack.c.bf16 %v1552_v7, %v1552_v7 }
 0xeb2   : > { %1943 = vmatmul.mubr.msk.bf16.vlgmr.msra.gmra.mrb[32].mxu1 %vm618_vm4, %v1557_v52  ;;  %vm1654_vm4 = vcmask 8192  }
 0xeb3   : > { %1948 = vmatprep.mubr.msk.bf16.mxu1 %vm2077_vm0, %v2076_v3  ;;  %1947 = vmatpush3.bf16.msra.mxu1 %v1608_v11  ;;  %vm1610_vm0 = vcmask 130048  }
 0xf85   : > { %v1598_v22 = vpop.f32.mrb[32].mxu1 }
 0xf86   : > { %v1599_v13 = vadd.f32 %v1598_v22, %v1560_v12  ;;  %v1944_v14 = vpop.f32.mrb[33].mxu1 }
 0xf87   : > { %v1601_v15 = vpop.f32.mrb[34].mxu1 }
 0xf88   : > { %v1604_v16 = vmax.f32 %v1599_v13, 0.0  ;;  %v1945_v3 = vpop.f32.mrb[35].mxu1 }
 0xf8a   : > { %v1607_v20 = vpack.c.bf16 %v1604_v16, %v1604_v16 }
 0xf8c   : > { %1949 = vmatmul.mubr.msk.bf16.vlgmr.msra.gmra.mrb[36].mxu1 %vm1610_vm0, %v1607_v20 }
0x105f   : > { %v1648_v17 = vpop.f32.mrb[36].mxu1 }
0x1060   : > { %v1649_v18 = vadd.f32 %v1648_v17, %v1609_v29  ;;  %v1950_v21 = vpop.f32.mrb[37].mxu1 }
0x1061   : > { %v1651_v19 = vpop.f32.mrb[38].mxu1 }
0x1062   : > { %v1951_v32 = vpop.f32.mrb[39].mxu1  ;;  %v1655_v24 = vsel %vm1654_vm4, %v1649_v18, -inf }
0x1063   : > { %1656 = vmax.xlane.f32.xlu1 %v1655_v24 }
0x10f0   : > { %v1657_v25 = vpop.xlane.xlu1 %1656 }
0x10f1   : > { %v1658_v26 = vsub.f32 %v1649_v18, %v1657_v25 }
0x10f3   : > { %v1659_v27 = vmul.f32 1.442695, %v1658_v26 }
0x10f5   : > { %2008 = vpow2.f32 %v1659_v27 }
0x10ff   : > { %v2009_v28 = vpop.eup %2008 }
0x1100   : > { %v1661_v30 = vsel %vm1654_vm4, %v2009_v28, 0.0 }
0x1101   : > { %1662 = vadd.xlane.f32.xlu0 %v1661_v30 }
0x118e   : > { %v1663_v31 = vpop.xlane.xlu0 %1662 }
0x118f   : > { %2010 = vlog2.f32 %v1663_v31 }
0x1199   : > { %v2011_v33 = vpop.eup %2010 }
0x119a   : > { %v1665_v34 = vmul.f32 0.6931472, %v2011_v33 }
0x119c   : > { %v1666_v35 = vsub.f32 %v1658_v26, %v1665_v34 }
0x119e   : > { %1667 = vst.msk [vmem:[%s524_s19] sm:$0x1] %vm1654_vm4, %v1666_v35 }
0x119f   : > { %2025 = shalt.err (!%p2022_p3)
}
0x11a0   : > { %s2026_s23 = scalar_lea.hbm %s2515_s29, 16  ;;  %s2030_s30 = scalar_lea.hbm %s2574_s16, 32 }
0x11a1   : > { %p2027_p4 = scmp.ne.s32.totalorder %s2515_s29, %s2026_s23  ;;  %p2031_p9 = scmp.lt.u32.totalorder %s2515_s29, %s2574_s16 }
0x11a2   : > { %p2032_p10 = scmp.lt.u32.totalorder %s2030_s30, %s2026_s23  ;;  %p2034_p12 = scmp.lt.u32.totalorder %s2026_s23, %s2515_s29 }
0x11a3   : > { %p2028_p7 = pnand %p2027_p4, %p2203_p5 }
0x11a4   : > { %p2033_p11 = por %p2032_p10, %p2031_p9 }
0x11a5   : > { %p2029_p8 = pneg %p2028_p7 }
0x11a6   : > { %p2035_p13 = por %p2034_p12, %p2033_p11 }
0x11a8   : > { %p2036_p0 = pnand %p2035_p13, %p2029_p8 }
0x11aa   : > { %2039 = shalt.err (!%p2036_p0)
}
0x11ab   : > { %1952 = dma.vmem_to_hbm [thread:$0]  (%p2203_p5), %s2517_s27, 16, %s2515_s29, %s1669_s18  }
0x11ac PF: > { %p1958_p1 = scmp.ge.s32.totalorder %s2074_s24, 2  ;;  %s1693_s2 = sand.u32 1, %s2062_s21  }
0x11ad   : > { %s1694_s20 = scalar_lea.sflag [#allocation3], %s1693_s2 }
0x11ae   : > { %p1955_p2 = pnand %p1958_p1, %p2207_p6 }
0x11b0   : > { %2057 = dma.done.wait (!%p1955_p2), %s1694_s20, 16  }
0x11b1   : > { %2059 = vsyncadd (!%p1955_p2), %s1694_s20, 4294967280  ;;  %s2591_s24 = sld [smem:[#allocation6_spill]]  ;;  %s2592_s25 = sld [smem:[#allocation5_spill]] }
0x11b2   : > { %s2593_s23 = sld [smem:[#allocation7_spill]]  ;;  %s2594_s21 = smov %s2066_s22 }
0x11b7   : > { %p26_p3 = scmp.ge.s32.totalorder %s2591_s24, 4   ;;  %s2595_s22 = smov %s2592_s25 }
0x11b9   :  { %28 = sbr.rel (!%p26_p3) target bundleno = 7 (0x7), region = 122 }
0x11c0   :  { %1698 = vsyncpa [#allocation3], 1 }
0x11c1   :  { %1700 = vsyncpa [#allocation3 + $0x1], 1 }

</bundles_post_ra>
